<compile_context>
chip_gen: v5e
topology: v5e:2x2
jax: 0.10.0
libtpu: 0.0.40
codegen_flags: <defaults>
</compile_context>

<pallas_src>
import functools

import jax
import jax.numpy as jnp
from jax import lax
from jax.experimental import pallas as pl
from jax.experimental.pallas import tpu as pltpu

LAYERS = [2, 80, 80, 80, 80, 80, 3]
H = 80              # true hidden width
HP = 128            # lane-padded hidden width
OUT = 3             # S, E, I
N_HID = len(LAYERS) - 3   # number of stacked (80,80) hidden layers = 4
SUB = 128           # rows per in-kernel sub-chunk (keeps activations in vregs)
TARGET_TM = 2048    # target rows per grid step (out block dbl-buffered: 2 MiB)


def _mlp_kernel(x_ref, t_ref, w0_ref, b0_ref, wh_ref, bh_ref, w5_ref, b5_ref,
                out_ref):
    """Whole padded MLP for one (tm, HP) output tile, weight-stationary."""
    tm = out_ref.shape[0]
    num_sub = tm // SUB

    # Hoist the tiny first-layer rows / biases out of the row loop
    # (JAX does not CSE broadcast_in_dim; keep these loads loop-invariant).
    w0_x = w0_ref[0:1, :]          # (1, HP)
    w0_t = w0_ref[1:2, :]          # (1, HP)
    b0 = b0_ref[...]               # (1, HP)
    b5 = b5_ref[...]               # (1, HP)

    def body(c, carry):
        off = pl.multiple_of(c * SUB, SUB)
        xc = x_ref[pl.ds(off, SUB), :]          # (SUB, 1) f32
        tc = t_ref[pl.ds(off, SUB), :]          # (SUB, 1) f32

        # Layer 0 (fan_in = 2): VPU broadcast formulation instead of a
        # degenerate K=2 MXU push.  Padding columns stay exactly zero.
        h = jnp.tanh(xc * w0_x + tc * w0_t + b0)        # (SUB, HP) f32

        # Four hidden layers: bf16 MXU inputs, f32 accumulate, f32 bias+tanh.
        for l in range(N_HID):
            z = jnp.dot(h.astype(jnp.bfloat16), wh_ref[l],
                        preferred_element_type=jnp.float32) + bh_ref[l]
            h = jnp.tanh(z)

        # Final linear layer, lane-dense 128-wide (only cols 0:3 meaningful).
        out = jnp.dot(h.astype(jnp.bfloat16), w5_ref[...],
                      preferred_element_type=jnp.float32) + b5
        out_ref[pl.ds(off, SUB), :] = out
        return carry

    lax.fori_loop(0, num_sub, body, 0, unroll=True)


def init_params(key, layers=LAYERS):
    """PyTorch-Linear-style init: U(-1/sqrt(fan_in), 1/sqrt(fan_in))."""
    params = []
    for i in range(len(layers) - 1):
        fan_in, fan_out = layers[i], layers[i + 1]
        key, kw, kb = jax.random.split(key, 3)
        bound = 1.0 / jnp.sqrt(jnp.float32(fan_in))
        w = jax.random.uniform(kw, (fan_in, fan_out), jnp.float32,
                               minval=-bound, maxval=bound)
        b = jax.random.uniform(kb, (1, fan_out), jnp.float32,
                               minval=-bound, maxval=bound)
        params.append((w, b))
    return params


def pack_params(params):
    """Zero-pad to lane width 128, stack hidden layers, cast MXU weights to bf16.

    Padding is exact: pad rows/cols of weights and biases are zero, so padded
    activations stay tanh(0)=0 and the extra output columns are exactly zero.
    """
    f32 = jnp.float32
    w0, b0 = params[0]
    w0p = jnp.zeros((LAYERS[0], HP), f32).at[:, :H].set(w0)
    b0p = jnp.zeros((1, HP), f32).at[:, :H].set(jnp.reshape(b0, (1, H)))

    wh = jnp.zeros((N_HID, HP, HP), f32)
    bh = jnp.zeros((N_HID, 1, HP), f32)
    for l in range(N_HID):
        w, b = params[1 + l]
        wh = wh.at[l, :H, :H].set(w)
        bh = bh.at[l, :, :H].set(jnp.reshape(b, (1, H)))

    w5, b5 = params[-1]
    w5p = jnp.zeros((HP, HP), f32).at[:H, :OUT].set(w5)
    b5p = jnp.zeros((1, HP), f32).at[:, :OUT].set(jnp.reshape(b5, (1, OUT)))

    return dict(w0=w0p, b0=b0p,
                wh=wh.astype(jnp.bfloat16), bh=bh,
                w5=w5p.astype(jnp.bfloat16), b5=b5p)


@functools.partial(jax.jit, static_argnames=("tm",))
def _dnn_forward_padded(x_pad, t_pad, packed, tm):
    n_pad = x_pad.shape[0]
    grid = (n_pad // tm,)

    # advisory cost estimate (padded dims)
    flops = n_pad * (2 * LAYERS[0] * HP + 2 * (N_HID + 1) * HP * HP)
    transcendentals = n_pad * (N_HID + 1) * HP
    param_bytes = (2 * HP * 4 + HP * 4                      # w0, b0
                   + N_HID * HP * HP * 2 + N_HID * HP * 4   # wh (bf16), bh
                   + HP * HP * 2 + HP * 4)                  # w5 (bf16), b5
    bytes_accessed = n_pad * (2 * 4 + HP * 4) + param_bytes

    return pl.pallas_call(
        _mlp_kernel,
        out_shape=jax.ShapeDtypeStruct((n_pad, HP), jnp.float32),
        grid_spec=pltpu.PrefetchScalarGridSpec(
            num_scalar_prefetch=0,
            grid=grid,
            in_specs=[
                pl.BlockSpec((tm, 1), lambda i: (i, 0)),             # x
                pl.BlockSpec((tm, 1), lambda i: (i, 0)),             # t
                pl.BlockSpec((LAYERS[0], HP), lambda i: (0, 0)),     # w0
                pl.BlockSpec((1, HP), lambda i: (0, 0)),             # b0
                pl.BlockSpec((N_HID, HP, HP), lambda i: (0, 0, 0)),  # wh stack
                pl.BlockSpec((N_HID, 1, HP), lambda i: (0, 0, 0)),   # bh stack
                pl.BlockSpec((HP, HP), lambda i: (0, 0)),            # w5
                pl.BlockSpec((1, HP), lambda i: (0, 0)),             # b5
            ],
            out_specs=pl.BlockSpec((tm, HP), lambda i: (i, 0)),
        ),
        compiler_params=pltpu.CompilerParams(
            dimension_semantics=("parallel",)),
        cost_estimate=pl.CostEstimate(flops=flops,
                                      transcendentals=transcendentals,
                                      bytes_accessed=bytes_accessed),
    )(x_pad, t_pad, packed["w0"], packed["b0"], packed["wh"],
      packed["bh"], packed["w5"], packed["b5"])


def dnn_forward(x, t, packed):
    """Equivalent of PhysicsInformedNN.DNN.forward(x, t) -> (N, 3)."""
    x = jnp.asarray(x, jnp.float32).reshape(-1, 1)
    t = jnp.asarray(t, jnp.float32).reshape(-1, 1)
    n = x.shape[0]

    # Row tile: large enough to amortize per-grid-step overhead, but aim for
    # >= 2 grid steps when the batch allows (keeps both v7x TCs busy).
    n_sub = pl.cdiv(n, SUB)
    tm = SUB * max(1, min(TARGET_TM // SUB, pl.cdiv(n_sub, 2)))
    n_pad = pl.cdiv(n, tm) * tm
    if n_pad != n:
        pad = n_pad - n
        x = jnp.pad(x, ((0, pad), (0, 0)))
        t = jnp.pad(t, ((0, pad), (0, 0)))

    out = _dnn_forward_padded(x, t, packed, tm)
    return out[:n, :OUT]          # single contiguous slice of the padded output


def net_SEIRD(x, t, packed):
    """Mirror of PhysicsInformedNN.net_SEIRD: split MLP output into S, E, I."""
    sei = dnn_forward(x, t, packed)
    S = sei[:, 0:1]
    E = sei[:, 1:2]
    I = sei[:, 2:3]
    return S, E, I


def _reference_forward_f32(x, t, params):
    """Pure-f32 pure-JAX reference (matches the PyTorch module exactly)."""
    h = jnp.hstack((x, t)).astype(jnp.float32)
    for i, (w, b) in enumerate(params):
        h = h @ w + b
        if i < len(params) - 1:
            h = jnp.tanh(h)
    return h


def _reference_forward_mixed(x, t, packed):
    """Pure-JAX reference using the kernel's exact dtype policy."""
    x = jnp.asarray(x, jnp.float32)
    t = jnp.asarray(t, jnp.float32)
    h = jnp.tanh(x * packed["w0"][0:1, :] + t * packed["w0"][1:2, :]
                 + packed["b0"])
    for l in range(N_HID):
        z = jnp.dot(h.astype(jnp.bfloat16), packed["wh"][l],
                    preferred_element_type=jnp.float32) + packed["bh"][l]
        h = jnp.tanh(z)
    out = jnp.dot(h.astype(jnp.bfloat16), packed["w5"],
                  preferred_element_type=jnp.float32) + packed["b5"]
    return out[:, :OUT]


if __name__ == "__main__":
    key = jax.random.PRNGKey(0)
    key, kx, kt = jax.random.split(key, 3)

    # Deliberately NOT a multiple of the tile size -> exercises the ragged path.
    N = 300
    x = jax.random.uniform(kx, (N, 1), jnp.float32, minval=0.0, maxval=1.0)
    t = jax.random.uniform(kt, (N, 1), jnp.float32, minval=0.0, maxval=1.0)

    params = init_params(jax.random.PRNGKey(0))
    packed = pack_params(params)

    S, E, I = net_SEIRD(x, t, packed)
    jax.block_until_ready((S, E, I))

    sei = jnp.concatenate([S, E, I], axis=1)
    assert sei.shape == (N, OUT)

    # 1) Translation check: kernel vs pure-JAX reference with the same
    #    bf16-input / f32-accumulate policy.
    ref_mixed = _reference_forward_mixed(x, t, packed)
    err_mixed = float(jnp.max(jnp.abs(sei - ref_mixed)))
    assert err_mixed < 5e-3, f"mismatch vs matched-precision reference: {err_mixed}"

    # 2) Precision sanity: kernel vs full-f32 reference of the original module.
    ref_f32 = _reference_forward_f32(x, t, params)[:, :OUT]
    err_f32 = float(jnp.max(jnp.abs(sei - ref_f32)))
    assert err_f32 < 5e-2, f"mismatch vs f32 reference: {err_f32}"

    # TODO(synk): net_SEIRD_x / net_r_SEIRD need autodiff w.r.t. x,t
    # (torch.autograd.grad); obtainable via jax.grad over this wrapper but not
    # part of the forward-pass hot path implemented here.
    print("KERNEL_OK")
</pallas_src>

<mosaic_0001>
module attributes {stable_mosaic.version = 11 : i64} {
  func.func @_mlp_kernel(%arg0: i32, %arg1: memref<256x1xf32, #tpu.memory_space<vmem>>, %arg2: memref<256x1xf32, #tpu.memory_space<vmem>>, %arg3: memref<2x128xf32, #tpu.memory_space<vmem>>, %arg4: memref<1x128xf32, #tpu.memory_space<vmem>>, %arg5: memref<4x128x128xbf16, #tpu.memory_space<vmem>>, %arg6: memref<4x1x128xf32, #tpu.memory_space<vmem>>, %arg7: memref<128x128xbf16, #tpu.memory_space<vmem>>, %arg8: memref<1x128xf32, #tpu.memory_space<vmem>>, %arg9: memref<256x128xf32, #tpu.memory_space<vmem>>) attributes {dimension_semantics = [#tpu.dimension_semantics<parallel>], iteration_bounds = array<i64: 2>, scalar_prefetch = 0 : i64, scratch_operands = 0 : i64, tpu.core_type = #tpu.core_type<tc>, window_params = [{transform_indices = @transform_0, window_bounds = array<i64: 256, 1>}, {transform_indices = @transform_1, window_bounds = array<i64: 256, 1>}, {pipeline_mode = #tpu.pipeline_mode<synchronous>, transform_indices = @transform_2, window_bounds = array<i64: 2, 128>}, {pipeline_mode = #tpu.pipeline_mode<synchronous>, transform_indices = @transform_3, window_bounds = array<i64: 1, 128>}, {pipeline_mode = #tpu.pipeline_mode<synchronous>, transform_indices = @transform_4, window_bounds = array<i64: 4, 128, 128>}, {pipeline_mode = #tpu.pipeline_mode<synchronous>, transform_indices = @transform_5, window_bounds = array<i64: 4, 1, 128>}, {pipeline_mode = #tpu.pipeline_mode<synchronous>, transform_indices = @transform_6, window_bounds = array<i64: 128, 128>}, {pipeline_mode = #tpu.pipeline_mode<synchronous>, transform_indices = @transform_7, window_bounds = array<i64: 1, 128>}, {transform_indices = @transform_8, window_bounds = array<i64: 256, 128>}]} {
    %c0 = arith.constant 0 : index
    %c0_0 = arith.constant 0 : index
    %0 = vector.load %arg3[%c0, %c0_0] : memref<2x128xf32, #tpu.memory_space<vmem>>, vector<1x128xf32>
    %c1 = arith.constant 1 : index
    %c0_1 = arith.constant 0 : index
    %1 = vector.load %arg3[%c1, %c0_1] : memref<2x128xf32, #tpu.memory_space<vmem>>, vector<1x128xf32>
    %c0_2 = arith.constant 0 : index
    %c0_3 = arith.constant 0 : index
    %2 = vector.load %arg4[%c0_2, %c0_3] : memref<1x128xf32, #tpu.memory_space<vmem>>, vector<1x128xf32>
    %c0_4 = arith.constant 0 : index
    %c0_5 = arith.constant 0 : index
    %3 = vector.load %arg8[%c0_4, %c0_5] : memref<1x128xf32, #tpu.memory_space<vmem>>, vector<1x128xf32>
    %c0_i32 = arith.constant 0 : i32
    %c128_i32 = arith.constant 128 : i32
    %4 = arith.muli %c0_i32, %c128_i32 : i32
    %5 = tpu.assume_multiple %4, 128 : i32
    %6 = arith.index_cast %5 : i32 to index
    %c0_6 = arith.constant 0 : index
    %7 = vector.load %arg1[%6, %c0_6] : memref<256x1xf32, #tpu.memory_space<vmem>>, vector<128x1xf32>
    %8 = arith.index_cast %5 : i32 to index
    %c0_7 = arith.constant 0 : index
    %9 = vector.load %arg2[%8, %c0_7] : memref<256x1xf32, #tpu.memory_space<vmem>>, vector<128x1xf32>
    %10 = vector.broadcast %7 : vector<128x1xf32> to vector<128x128xf32>
    %11 = vector.broadcast %0 : vector<1x128xf32> to vector<128x128xf32>
    %12 = arith.mulf %10, %11 : vector<128x128xf32>
    %13 = vector.broadcast %9 : vector<128x1xf32> to vector<128x128xf32>
    %14 = vector.broadcast %1 : vector<1x128xf32> to vector<128x128xf32>
    %15 = arith.mulf %13, %14 : vector<128x128xf32>
    %16 = arith.addf %12, %15 : vector<128x128xf32>
    %17 = vector.broadcast %2 : vector<1x128xf32> to vector<128x128xf32>
    %18 = arith.addf %16, %17 : vector<128x128xf32>
    %19 = math.tanh %18 : vector<128x128xf32>
    %20 = arith.truncf %19 : vector<128x128xf32> to vector<128x128xbf16>
    %c0_8 = arith.constant 0 : index
    %c0_9 = arith.constant 0 : index
    %c0_10 = arith.constant 0 : index
    %21 = vector.load %arg5[%c0_8, %c0_9, %c0_10] : memref<4x128x128xbf16, #tpu.memory_space<vmem>>, vector<1x128x128xbf16>
    %22 = vector.shape_cast %21 : vector<1x128x128xbf16> to vector<128x128xbf16>
    %cst = arith.constant dense<0.000000e+00> : vector<128x128xf32>
    %23 = tpu.matmul %20, %22, %cst {dimension_numbers = #tpu.dot_dimension_numbers<[1], [0], [0], [1], [0, 0, 1, 1], [], []>} : vector<128x128xbf16>, vector<128x128xbf16>, vector<128x128xf32> -> vector<128x128xf32>
    %c0_11 = arith.constant 0 : index
    %c0_12 = arith.constant 0 : index
    %c0_13 = arith.constant 0 : index
    %24 = vector.load %arg6[%c0_11, %c0_12, %c0_13] : memref<4x1x128xf32, #tpu.memory_space<vmem>>, vector<1x1x128xf32>
    %25 = vector.shape_cast %24 : vector<1x1x128xf32> to vector<1x128xf32>
    %26 = vector.broadcast %25 : vector<1x128xf32> to vector<128x128xf32>
    %27 = arith.addf %23, %26 : vector<128x128xf32>
    %28 = math.tanh %27 : vector<128x128xf32>
    %29 = arith.truncf %28 : vector<128x128xf32> to vector<128x128xbf16>
    %c1_14 = arith.constant 1 : index
    %c0_15 = arith.constant 0 : index
    %c0_16 = arith.constant 0 : index
    %30 = vector.load %arg5[%c1_14, %c0_15, %c0_16] : memref<4x128x128xbf16, #tpu.memory_space<vmem>>, vector<1x128x128xbf16>
    %31 = vector.shape_cast %30 : vector<1x128x128xbf16> to vector<128x128xbf16>
    %cst_17 = arith.constant dense<0.000000e+00> : vector<128x128xf32>
    %32 = tpu.matmul %29, %31, %cst_17 {dimension_numbers = #tpu.dot_dimension_numbers<[1], [0], [0], [1], [0, 0, 1, 1], [], []>} : vector<128x128xbf16>, vector<128x128xbf16>, vector<128x128xf32> -> vector<128x128xf32>
    %c1_18 = arith.constant 1 : index
    %c0_19 = arith.constant 0 : index
    %c0_20 = arith.constant 0 : index
    %33 = vector.load %arg6[%c1_18, %c0_19, %c0_20] : memref<4x1x128xf32, #tpu.memory_space<vmem>>, vector<1x1x128xf32>
    %34 = vector.shape_cast %33 : vector<1x1x128xf32> to vector<1x128xf32>
    %35 = vector.broadcast %34 : vector<1x128xf32> to vector<128x128xf32>
    %36 = arith.addf %32, %35 : vector<128x128xf32>
    %37 = math.tanh %36 : vector<128x128xf32>
    %38 = arith.truncf %37 : vector<128x128xf32> to vector<128x128xbf16>
    %c2 = arith.constant 2 : index
    %c0_21 = arith.constant 0 : index
    %c0_22 = arith.constant 0 : index
    %39 = vector.load %arg5[%c2, %c0_21, %c0_22] : memref<4x128x128xbf16, #tpu.memory_space<vmem>>, vector<1x128x128xbf16>
    %40 = vector.shape_cast %39 : vector<1x128x128xbf16> to vector<128x128xbf16>
    %cst_23 = arith.constant dense<0.000000e+00> : vector<128x128xf32>
    %41 = tpu.matmul %38, %40, %cst_23 {dimension_numbers = #tpu.dot_dimension_numbers<[1], [0], [0], [1], [0, 0, 1, 1], [], []>} : vector<128x128xbf16>, vector<128x128xbf16>, vector<128x128xf32> -> vector<128x128xf32>
    %c2_24 = arith.constant 2 : index
    %c0_25 = arith.constant 0 : index
    %c0_26 = arith.constant 0 : index
    %42 = vector.load %arg6[%c2_24, %c0_25, %c0_26] : memref<4x1x128xf32, #tpu.memory_space<vmem>>, vector<1x1x128xf32>
    %43 = vector.shape_cast %42 : vector<1x1x128xf32> to vector<1x128xf32>
    %44 = vector.broadcast %43 : vector<1x128xf32> to vector<128x128xf32>
    %45 = arith.addf %41, %44 : vector<128x128xf32>
    %46 = math.tanh %45 : vector<128x128xf32>
    %47 = arith.truncf %46 : vector<128x128xf32> to vector<128x128xbf16>
    %c3 = arith.constant 3 : index
    %c0_27 = arith.constant 0 : index
    %c0_28 = arith.constant 0 : index
    %48 = vector.load %arg5[%c3, %c0_27, %c0_28] : memref<4x128x128xbf16, #tpu.memory_space<vmem>>, vector<1x128x128xbf16>
    %49 = vector.shape_cast %48 : vector<1x128x128xbf16> to vector<128x128xbf16>
    %cst_29 = arith.constant dense<0.000000e+00> : vector<128x128xf32>
    %50 = tpu.matmul %47, %49, %cst_29 {dimension_numbers = #tpu.dot_dimension_numbers<[1], [0], [0], [1], [0, 0, 1, 1], [], []>} : vector<128x128xbf16>, vector<128x128xbf16>, vector<128x128xf32> -> vector<128x128xf32>
    %c3_30 = arith.constant 3 : index
    %c0_31 = arith.constant 0 : index
    %c0_32 = arith.constant 0 : index
    %51 = vector.load %arg6[%c3_30, %c0_31, %c0_32] : memref<4x1x128xf32, #tpu.memory_space<vmem>>, vector<1x1x128xf32>
    %52 = vector.shape_cast %51 : vector<1x1x128xf32> to vector<1x128xf32>
    %53 = vector.broadcast %52 : vector<1x128xf32> to vector<128x128xf32>
    %54 = arith.addf %50, %53 : vector<128x128xf32>
    %55 = math.tanh %54 : vector<128x128xf32>
    %56 = arith.truncf %55 : vector<128x128xf32> to vector<128x128xbf16>
    %c0_33 = arith.constant 0 : index
    %c0_34 = arith.constant 0 : index
    %57 = vector.load %arg7[%c0_33, %c0_34] : memref<128x128xbf16, #tpu.memory_space<vmem>>, vector<128x128xbf16>
    %cst_35 = arith.constant dense<0.000000e+00> : vector<128x128xf32>
    %58 = tpu.matmul %56, %57, %cst_35 {dimension_numbers = #tpu.dot_dimension_numbers<[1], [0], [0], [1], [0, 0, 1, 1], [], []>} : vector<128x128xbf16>, vector<128x128xbf16>, vector<128x128xf32> -> vector<128x128xf32>
    %59 = vector.broadcast %3 : vector<1x128xf32> to vector<128x128xf32>
    %60 = arith.addf %58, %59 : vector<128x128xf32>
    %61 = arith.index_cast %5 : i32 to index
    %c0_36 = arith.constant 0 : index
    %62 = vector.load %arg9[%61, %c0_36] : memref<256x128xf32, #tpu.memory_space<vmem>>, vector<128x128xf32>
    tpu.vector_store %arg9[%61, %c0_36], %60 {strides = array<i32>} : memref<256x128xf32, #tpu.memory_space<vmem>>, vector<128x128xf32>,
    %c1_i32 = arith.constant 1 : i32
    %c128_i32_37 = arith.constant 128 : i32
    %63 = arith.muli %c1_i32, %c128_i32_37 : i32
    %64 = tpu.assume_multiple %63, 128 : i32
    %65 = arith.index_cast %64 : i32 to index
    %c0_38 = arith.constant 0 : index
    %66 = vector.load %arg1[%65, %c0_38] : memref<256x1xf32, #tpu.memory_space<vmem>>, vector<128x1xf32>
    %67 = arith.index_cast %64 : i32 to index
    %c0_39 = arith.constant 0 : index
    %68 = vector.load %arg2[%67, %c0_39] : memref<256x1xf32, #tpu.memory_space<vmem>>, vector<128x1xf32>
    %69 = vector.broadcast %66 : vector<128x1xf32> to vector<128x128xf32>
    %70 = vector.broadcast %0 : vector<1x128xf32> to vector<128x128xf32>
    %71 = arith.mulf %69, %70 : vector<128x128xf32>
    %72 = vector.broadcast %68 : vector<128x1xf32> to vector<128x128xf32>
    %73 = vector.broadcast %1 : vector<1x128xf32> to vector<128x128xf32>
    %74 = arith.mulf %72, %73 : vector<128x128xf32>
    %75 = arith.addf %71, %74 : vector<128x128xf32>
    %76 = vector.broadcast %2 : vector<1x128xf32> to vector<128x128xf32>
    %77 = arith.addf %75, %76 : vector<128x128xf32>
    %78 = math.tanh %77 : vector<128x128xf32>
    %79 = arith.truncf %78 : vector<128x128xf32> to vector<128x128xbf16>
    %c0_40 = arith.constant 0 : index
    %c0_41 = arith.constant 0 : index
    %c0_42 = arith.constant 0 : index
    %80 = vector.load %arg5[%c0_40, %c0_41, %c0_42] : memref<4x128x128xbf16, #tpu.memory_space<vmem>>, vector<1x128x128xbf16>
    %81 = vector.shape_cast %80 : vector<1x128x128xbf16> to vector<128x128xbf16>
    %cst_43 = arith.constant dense<0.000000e+00> : vector<128x128xf32>
    %82 = tpu.matmul %79, %81, %cst_43 {dimension_numbers = #tpu.dot_dimension_numbers<[1], [0], [0], [1], [0, 0, 1, 1], [], []>} : vector<128x128xbf16>, vector<128x128xbf16>, vector<128x128xf32> -> vector<128x128xf32>
    %c0_44 = arith.constant 0 : index
    %c0_45 = arith.constant 0 : index
    %c0_46 = arith.constant 0 : index
    %83 = vector.load %arg6[%c0_44, %c0_45, %c0_46] : memref<4x1x128xf32, #tpu.memory_space<vmem>>, vector<1x1x128xf32>
    %84 = vector.shape_cast %83 : vector<1x1x128xf32> to vector<1x128xf32>
    %85 = vector.broadcast %84 : vector<1x128xf32> to vector<128x128xf32>
    %86 = arith.addf %82, %85 : vector<128x128xf32>
    %87 = math.tanh %86 : vector<128x128xf32>
    %88 = arith.truncf %87 : vector<128x128xf32> to vector<128x128xbf16>
    %c1_47 = arith.constant 1 : index
    %c0_48 = arith.constant 0 : index
    %c0_49 = arith.constant 0 : index
    %89 = vector.load %arg5[%c1_47, %c0_48, %c0_49] : memref<4x128x128xbf16, #tpu.memory_space<vmem>>, vector<1x128x128xbf16>
    %90 = vector.shape_cast %89 : vector<1x128x128xbf16> to vector<128x128xbf16>
    %cst_50 = arith.constant dense<0.000000e+00> : vector<128x128xf32>
    %91 = tpu.matmul %88, %90, %cst_50 {dimension_numbers = #tpu.dot_dimension_numbers<[1], [0], [0], [1], [0, 0, 1, 1], [], []>} : vector<128x128xbf16>, vector<128x128xbf16>, vector<128x128xf32> -> vector<128x128xf32>
    %c1_51 = arith.constant 1 : index
    %c0_52 = arith.constant 0 : index
    %c0_53 = arith.constant 0 : index
    %92 = vector.load %arg6[%c1_51, %c0_52, %c0_53] : memref<4x1x128xf32, #tpu.memory_space<vmem>>, vector<1x1x128xf32>
    %93 = vector.shape_cast %92 : vector<1x1x128xf32> to vector<1x128xf32>
    %94 = vector.broadcast %93 : vector<1x128xf32> to vector<128x128xf32>
    %95 = arith.addf %91, %94 : vector<128x128xf32>
    %96 = math.tanh %95 : vector<128x128xf32>
    %97 = arith.truncf %96 : vector<128x128xf32> to vector<128x128xbf16>
    %c2_54 = arith.constant 2 : index
    %c0_55 = arith.constant 0 : index
    %c0_56 = arith.constant 0 : index
    %98 = vector.load %arg5[%c2_54, %c0_55, %c0_56] : memref<4x128x128xbf16, #tpu.memory_space<vmem>>, vector<1x128x128xbf16>
    %99 = vector.shape_cast %98 : vector<1x128x128xbf16> to vector<128x128xbf16>
    %cst_57 = arith.constant dense<0.000000e+00> : vector<128x128xf32>
    %100 = tpu.matmul %97, %99, %cst_57 {dimension_numbers = #tpu.dot_dimension_numbers<[1], [0], [0], [1], [0, 0, 1, 1], [], []>} : vector<128x128xbf16>, vector<128x128xbf16>, vector<128x128xf32> -> vector<128x128xf32>
    %c2_58 = arith.constant 2 : index
    %c0_59 = arith.constant 0 : index
    %c0_60 = arith.constant 0 : index
    %101 = vector.load %arg6[%c2_58, %c0_59, %c0_60] : memref<4x1x128xf32, #tpu.memory_space<vmem>>, vector<1x1x128xf32>
    %102 = vector.shape_cast %101 : vector<1x1x128xf32> to vector<1x128xf32>
    %103 = vector.broadcast %102 : vector<1x128xf32> to vector<128x128xf32>
    %104 = arith.addf %100, %103 : vector<128x128xf32>
    %105 = math.tanh %104 : vector<128x128xf32>
    %106 = arith.truncf %105 : vector<128x128xf32> to vector<128x128xbf16>
    %c3_61 = arith.constant 3 : index
    %c0_62 = arith.constant 0 : index
    %c0_63 = arith.constant 0 : index
    %107 = vector.load %arg5[%c3_61, %c0_62, %c0_63] : memref<4x128x128xbf16, #tpu.memory_space<vmem>>, vector<1x128x128xbf16>
    %108 = vector.shape_cast %107 : vector<1x128x128xbf16> to vector<128x128xbf16>
    %cst_64 = arith.constant dense<0.000000e+00> : vector<128x128xf32>
    %109 = tpu.matmul %106, %108, %cst_64 {dimension_numbers = #tpu.dot_dimension_numbers<[1], [0], [0], [1], [0, 0, 1, 1], [], []>} : vector<128x128xbf16>, vector<128x128xbf16>, vector<128x128xf32> -> vector<128x128xf32>
    %c3_65 = arith.constant 3 : index
    %c0_66 = arith.constant 0 : index
    %c0_67 = arith.constant 0 : index
    %110 = vector.load %arg6[%c3_65, %c0_66, %c0_67] : memref<4x1x128xf32, #tpu.memory_space<vmem>>, vector<1x1x128xf32>
    %111 = vector.shape_cast %110 : vector<1x1x128xf32> to vector<1x128xf32>
    %112 = vector.broadcast %111 : vector<1x128xf32> to vector<128x128xf32>
    %113 = arith.addf %109, %112 : vector<128x128xf32>
    %114 = math.tanh %113 : vector<128x128xf32>
    %115 = arith.truncf %114 : vector<128x128xf32> to vector<128x128xbf16>
    %c0_68 = arith.constant 0 : index
    %c0_69 = arith.constant 0 : index
    %116 = vector.load %arg7[%c0_68, %c0_69] : memref<128x128xbf16, #tpu.memory_space<vmem>>, vector<128x128xbf16>
    %cst_70 = arith.constant dense<0.000000e+00> : vector<128x128xf32>
    %117 = tpu.matmul %115, %116, %cst_70 {dimension_numbers = #tpu.dot_dimension_numbers<[1], [0], [0], [1], [0, 0, 1, 1], [], []>} : vector<128x128xbf16>, vector<128x128xbf16>, vector<128x128xf32> -> vector<128x128xf32>
    %118 = vector.broadcast %3 : vector<1x128xf32> to vector<128x128xf32>
    %119 = arith.addf %117, %118 : vector<128x128xf32>
    %120 = arith.index_cast %64 : i32 to index
    %c0_71 = arith.constant 0 : index
    %121 = vector.load %arg9[%120, %c0_71] : memref<256x128xf32, #tpu.memory_space<vmem>>, vector<128x128xf32>
    tpu.vector_store %arg9[%120, %c0_71], %119 {strides = array<i32>} : memref<256x128xf32, #tpu.memory_space<vmem>>, vector<128x128xf32>,
    %c2_i32 = arith.constant 2 : i32
    return
  }
  func.func @transform_0(%arg0: i32) -> (i32, i32) {
    %c0_i32 = arith.constant 0 : i32
    %c0_i32_0 = arith.constant 0 : i32
    return %arg0, %c0_i32 : i32, i32
  }
  func.func @transform_1(%arg0: i32) -> (i32, i32) {
    %c0_i32 = arith.constant 0 : i32
    %c0_i32_0 = arith.constant 0 : i32
    return %arg0, %c0_i32 : i32, i32
  }
  func.func @transform_2(%arg0: i32) -> (i32, i32) {
    %c0_i32 = arith.constant 0 : i32
    %c0_i32_0 = arith.constant 0 : i32
    %c0_i32_1 = arith.constant 0 : i32
    return %c0_i32, %c0_i32_0 : i32, i32
  }
  func.func @transform_3(%arg0: i32) -> (i32, i32) {
    %c0_i32 = arith.constant 0 : i32
    %c0_i32_0 = arith.constant 0 : i32
    %c0_i32_1 = arith.constant 0 : i32
    return %c0_i32, %c0_i32_0 : i32, i32
  }
  func.func @transform_4(%arg0: i32) -> (i32, i32, i32) {
    %c0_i32 = arith.constant 0 : i32
    %c0_i32_0 = arith.constant 0 : i32
    %c0_i32_1 = arith.constant 0 : i32
    %c0_i32_2 = arith.constant 0 : i32
    return %c0_i32, %c0_i32_0, %c0_i32_1 : i32, i32, i32
  }
  func.func @transform_5(%arg0: i32) -> (i32, i32, i32) {
    %c0_i32 = arith.constant 0 : i32
    %c0_i32_0 = arith.constant 0 : i32
    %c0_i32_1 = arith.constant 0 : i32
    %c0_i32_2 = arith.constant 0 : i32
    return %c0_i32, %c0_i32_0, %c0_i32_1 : i32, i32, i32
  }
  func.func @transform_6(%arg0: i32) -> (i32, i32) {
    %c0_i32 = arith.constant 0 : i32
    %c0_i32_0 = arith.constant 0 : i32
    %c0_i32_1 = arith.constant 0 : i32
    return %c0_i32, %c0_i32_0 : i32, i32
  }
  func.func @transform_7(%arg0: i32) -> (i32, i32) {
    %c0_i32 = arith.constant 0 : i32
    %c0_i32_0 = arith.constant 0 : i32
    %c0_i32_1 = arith.constant 0 : i32
    return %c0_i32, %c0_i32_0 : i32, i32
  }
  func.func @transform_8(%arg0: i32) -> (i32, i32) {
    %c0_i32 = arith.constant 0 : i32
    %c0_i32_0 = arith.constant 0 : i32
    return %arg0, %c0_i32 : i32, i32
  }
}

</mosaic_0001>

<bundles_post_ra>
// kernel: _dnn_forward_padded.1
= control target key start
LH: loop header
LB: loop body
LE: loop exit
PB: predicated region body
PF: predicated region fallthrough
CT: control target
= control target key end

     0   :  { %13 = vsyncpa [#allocation3], 0  ;;  %s4206_s0 = inlined_call_operand.vmem [shape: f32[512,1], index: 0, kind: input, shape index: {}]   ;;  %s4207_s1 = inlined_call_operand.vmem [shape: f32[512,1], index: 1, kind: input, shape index: {}]   ;;  %s4208_s2 = inlined_call_operand.vmem [shape: f32[2,128], index: 2, kind: input, shape index: {}]   ;;  %s4209_s3 = inlined_call_operand.vmem [shape: f32[1,128], index: 3, kind: input, shape index: {}]   ;;  %s4210_s4 = inlined_call_operand.vmem [shape: bf16[4,128,128], index: 4, kind: input, shape index: {}]   ;;  %s4211_s5 = inlined_call_operand.vmem [shape: f32[4,1,128], index: 5, kind: input, shape index: {}]   ;;  %s4212_s6 = inlined_call_operand.vmem [shape: bf16[128,128], index: 6, kind: input, shape index: {}]   ;;  %s4213_s7 = inlined_call_operand.vmem [shape: f32[1,128], index: 7, kind: input, shape index: {}]   ;;  %s4214_s8 = inlined_call_operand.hbm [shape: f32[512,128], index: 8, kind: output, shape index: {}]  }
   0x1   :  { %15 = vsyncpa [#allocation3 + $0x1], 0  ;;  %s3456_s27 = smov 0   ;;  %s3458_s28 = smov 0  }
   0x2   :  { %s3460_s29 = smov 0   ;;  %s3462_s30 = smov 0  }
   0x3 LB: > { %s3477_s9 = sadd.s32 4294967295, %s3406_s30   ;;  %s2386_s10 = sadd.s32 4294967294, %s3406_s30   ;;  %s3406_s30 = sphi %s3462_s30, %s4220_s30   ;;  %s3402_s29 = sphi %s3460_s29, %s4219_s29   ;;  %s3398_s28 = sphi %s3458_s28, %s4218_s28   ;;  %s3394_s27 = sphi %s3456_s27, %s4217_s27  }
   0x4   : > { %s3481_s11 = sadd.s32 1, %s3406_s30   ;;  %s206_s12 = sadd.s32 1, %s3402_s29 }
   0x5   : > { %s203_s13 = ssub.s32 %s3406_s30, %s3481_s11  ;;  %p216_p0 = scmp.ne.s32.totalorder %s3402_s29, %s3398_s28 }
   0x6   : > { %p204_p1 = scmp.eq.s32.totalorder %s203_s13, 0  ;;  %p217_p2 = scmp.eq.s32.totalorder %s3477_s9, 1 }
   0x7   : > { %p222_p3 = scmp.ne.s32.totalorder %s3398_s28, %s3394_s27  ;;  %p223_p4 = scmp.eq.s32.totalorder %s2386_s10, 1 }
   0x8   : > { %s3492_s14 = scalar_select %p204_p1, %s3402_s29, %s206_s12  }
   0x9   : > { %p3494_p5 = por %p217_p2, %p216_p0  ;;  %p3498_p6 = por %p223_p4, %p222_p3 }
   0xa   : > { %p2389_p7 = scmp.ge.s32.totalorder %s3406_s30, 1  ;;  %p277_p8 = scmp.lt.s32.totalorder %s3406_s30, 3 }
   0xc   : > { %p278_p9 = pnand %p2389_p7, %p277_p8 }
   0xd   : > { %s2391_s17 = sshll.u32 (!%p278_p9), %s3477_s9, 5  ;;  %s2950_s22 = sshll.u32 (!%p278_p9), %s3477_s9, 8 }
   0xe   : > { %281 = sbr.rel (%p278_p9) target bundleno = 1279 (0x4ff), region = 52  ;;  %p317_p10 = scmp.lt.s32.totalorder (!%p278_p9), %s2391_s17, 63 }
   0xf   : > { %s3364_s20 = scalar_lea.hbm (!%p278_p9), %s4214_s8, 512 }
  0x13   : > { %v3408_v0 = vmov 0   ;;  %s4222_s17 = smov (!%p317_p10, %s2391_s17), 63  ;;  %v2877_v31 = vld [vmem:[%s4210_s4 + $0x38] sm:$0xff]  ;;  %v2876_v34 = vld [vmem:[%s4210_s4 + $0x30] sm:$0xff]  ;;  %v2875_v36 = vld [vmem:[%s4210_s4 + $0x28] sm:$0xff] }
  0x14   : > { %3011 = vset.pattern.permute.xlu2 %v3408_v0  ;;  %3010 = vset.pattern.permute.xlu1 %v3408_v0  ;;  %s2392_s18 = sshll.u32 %s4222_s17, 3  ;;  %v2874_v40 = vld [vmem:[%s4210_s4 + $0x20] sm:$0xff]  ;;  %v2873_v41 = vld [vmem:[%s4210_s4 + $0x18] sm:$0xff]  ;;  %v2872_v45 = vld [vmem:[%s4210_s4 + $0x10] sm:$0xff] }
  0x15   : > { %3009 = vset.pattern.permute.xlu0 %v3408_v0  ;;  %s3508_s21 = scalar_lea.vmem %s4207_s1, %s2392_s18  ;;  %s3513_s24 = scalar_lea.vmem %s4206_s0, %s2392_s18  ;;  %686 = vmatpush.bf16.msra.mxu0 %v2877_v31  ;;  %v2871_v46 = vld [vmem:[%s4210_s4 + $0x8] sm:$0xff]  ;;  %v2870_v51 = vld [vmem:[%s4210_s4] sm:$0xff] }
  0x16   : > { %v349_v1 = vld [vmem:[%s3508_s21] sm:$0xff]  ;;  %v335_v2 = vld [vmem:[%s3513_s24 + $0x10] sm:$0xff]  ;;  %v350_v4 = vld [vmem:[%s3508_s21 + $0x8] sm:$0xff]  ;;  %2951 = vmatpush.bf16.msra.mxu2 %v2877_v31 }
  0x17   : > { %v333_v3 = vld [vmem:[%s3513_s24] sm:$0xff]  ;;  %464 = vperm.xlu1 %3010, %v349_v1   ;;  %377 = vperm.xlu2 %3011, %v335_v2   ;;  %v336_v5 = vld [vmem:[%s3513_s24 + $0x18] sm:$0xff]  ;;  %v334_v6 = vld [vmem:[%s3513_s24 + $0x8] sm:$0xff] }
  0x18   : > { %367 = vperm.xlu0 %3009, %v333_v3   ;;  %v352_v7 = vld [vmem:[%s3508_s21 + $0x18] sm:$0xff]  ;;  %v337_v8 = vld [vmem:[%s3513_s24 + $0x20] sm:$0xff]  ;;  %v351_v9 = vld [vmem:[%s3508_s21 + $0x10] sm:$0xff] }
  0x19   : > { %v353_v10 = vld [vmem:[%s3508_s21 + $0x20] sm:$0xff]  ;;  %v354_v11 = vld [vmem:[%s3508_s21 + $0x28] sm:$0xff]  ;;  %v340_v13 = vld [vmem:[%s3513_s24 + $0x38] sm:$0xff]  ;;  %687 = vmatpush.bf16.msra.mxu0 %v2876_v34 }
  0x1a   : > { %v338_v12 = vld [vmem:[%s3513_s24 + $0x28] sm:$0xff]  ;;  %v355_v14 = vld [vmem:[%s3508_s21 + $0x30] sm:$0xff]  ;;  %v341_v16 = vld [vmem:[%s3513_s24 + $0x40] sm:$0xff]  ;;  %2952 = vmatpush.bf16.msra.mxu2 %v2876_v34 }
  0x1b   : > { %v339_v15 = vld [vmem:[%s3513_s24 + $0x30] sm:$0xff]  ;;  %v342_v17 = vld [vmem:[%s3513_s24 + $0x48] sm:$0xff]  ;;  %v356_v18 = vld [vmem:[%s3508_s21 + $0x38] sm:$0xff] }
  0x1c   : > { %v358_v19 = vld [vmem:[%s3508_s21 + $0x48] sm:$0xff]  ;;  %v343_v20 = vld [vmem:[%s3513_s24 + $0x50] sm:$0xff]  ;;  %v357_v21 = vld [vmem:[%s3508_s21 + $0x40] sm:$0xff] }
  0x1d   : > { %v359_v22 = vld [vmem:[%s3508_s21 + $0x50] sm:$0xff]  ;;  %v360_v23 = vld [vmem:[%s3508_s21 + $0x58] sm:$0xff]  ;;  %v346_v25 = vld [vmem:[%s3513_s24 + $0x68] sm:$0xff]  ;;  %688 = vmatpush.bf16.msra.mxu0 %v2875_v36 }
  0x1e   : > { %v344_v24 = vld [vmem:[%s3513_s24 + $0x58] sm:$0xff]  ;;  %v361_v26 = vld [vmem:[%s3508_s21 + $0x60] sm:$0xff]  ;;  %v347_v28 = vld [vmem:[%s3513_s24 + $0x70] sm:$0xff]  ;;  %2953 = vmatpush.bf16.msra.mxu2 %v2875_v36 }
  0x1f   : > { %469 = vperm.xlu1 %3010, %v350_v4   ;;  %382 = vperm.xlu2 %3011, %v336_v5   ;;  %v345_v27 = vld [vmem:[%s3513_s24 + $0x60] sm:$0xff]  ;;  %v348_v29 = vld [vmem:[%s3513_s24 + $0x78] sm:$0xff]  ;;  %v362_v30 = vld [vmem:[%s3508_s21 + $0x68] sm:$0xff] }
  0x20   : > { %372 = vperm.xlu0 %3009, %v334_v6   ;;  %v364_v32 = vld [vmem:[%s3508_s21 + $0x78] sm:$0xff]  ;;  %v2606_v33 = vld [vmem:[%s3513_s24 + $0x80] sm:$0xff]  ;;  %v363_v35 = vld [vmem:[%s3508_s21 + $0x70] sm:$0xff] }
  0x21   : > { %v2622_v37 = vld [vmem:[%s3508_s21 + $0x80] sm:$0xff]  ;;  %v2623_v38 = vld [vmem:[%s3508_s21 + $0x88] sm:$0xff]  ;;  %689 = vmatpush.bf16.msra.mxu0 %v2874_v40  ;;  %v2609_v42 = vld [vmem:[%s3513_s24 + $0x98] sm:$0xff] }
  0x22   : > { %v2607_v39 = vld [vmem:[%s3513_s24 + $0x88] sm:$0xff]  ;;  %2954 = vmatpush.bf16.msra.mxu2 %v2874_v40  ;;  %v2624_v43 = vld [vmem:[%s3508_s21 + $0x90] sm:$0xff]  ;;  %v2610_v48 = vld [vmem:[%s3513_s24 + $0xa0] sm:$0xff] }
  0x23   : > { %v2608_v44 = vld [vmem:[%s3513_s24 + $0x90] sm:$0xff]  ;;  %v2611_v49 = vld [vmem:[%s3513_s24 + $0xa8] sm:$0xff]  ;;  %v2625_v50 = vld [vmem:[%s3508_s21 + $0x98] sm:$0xff] }
  0x24   : > { %v2627_v52 = vld [vmem:[%s3508_s21 + $0xa8] sm:$0xff]  ;;  %v2612_v53 = vld [vmem:[%s3513_s24 + $0xb0] sm:$0xff]  ;;  %v2626_v54 = vld [vmem:[%s3508_s21 + $0xa0] sm:$0xff] }
  0x25   : > { %690 = vmatpush.bf16.msra.mxu0 %v2873_v41  ;;  %v3587_v56 = vld [vmem:[%s4208_s2] ss:$0 sm:$0xff]  ;;  %v3592_v57 = vld [vmem:[%s4208_s2 + $0x1] ss:$0 sm:$0xff]  ;;  %v2628_v62 = vld [vmem:[%s3508_s21 + $0xb0] sm:$0xff] }
  0x26   : > { %2955 = vmatpush.bf16.msra.mxu2 %v2873_v41  ;;  %v2629_v63 = vld [vmem:[%s3508_s21 + $0xb8] sm:$0xff]  ;;  %v3602_v2 = vld [vmem:[%s4209_s3] ss:$0 sm:$0xff]  ;;  %v2632_v36 = vld [vmem:[%s3508_s21 + $0xd0] sm:$0xff] }
  0x27   : > { %479 = vperm.xlu1 %3010, %v352_v7   ;;  %387 = vperm.xlu2 %3011, %v337_v8   ;;  %v2613_v0 = vld [vmem:[%s3513_s24 + $0xb8] sm:$0xff] }
  0x28   : > { %474 = vperm.xlu0 %3009, %v351_v9   ;;  %v2615_v9 = vld [vmem:[%s3513_s24 + $0xc8] sm:$0xff]  ;;  %v2633_v34 = vld [vmem:[%s3508_s21 + $0xd8] sm:$0xff] }
  0x29   : > { %691 = vmatpush.bf16.msra.mxu0 %v2872_v45 }
  0x2a   : > { %2956 = vmatpush.bf16.msra.mxu2 %v2872_v45 }
  0x2d   : > { %692 = vmatpush.bf16.msra.mxu0 %v2871_v46 }
  0x2e   : > { %2957 = vmatpush.bf16.msra.mxu2 %v2871_v46 }
  0x2f   : > { %484 = vperm.xlu1 %3010, %v353_v10   ;;  %489 = vperm.xlu2 %3011, %v354_v11   ;;  %v2630_v10 = vld [vmem:[%s3508_s21 + $0xc0] sm:$0xff] }
  0x30   : > { %392 = vperm.xlu0 %3009, %v338_v12   ;;  %v2614_v12 = vld [vmem:[%s3513_s24 + $0xc0] sm:$0xff] }
  0x31   : > { %693 = vmatpush.bf16.msra.mxu0 %v2870_v51 }
  0x32   : > { %2958 = vmatpush.bf16.msra.mxu2 %v2870_v51 }
  0x37   : > { %402 = vperm.xlu1 %3010, %v340_v13   ;;  %494 = vperm.xlu2 %3011, %v355_v14  }
  0x38   : > { %397 = vperm.xlu0 %3009, %v339_v15  }
  0x3f   : > { %407 = vperm.xlu1 %3010, %v341_v16   ;;  %412 = vperm.xlu2 %3011, %v342_v17  }
  0x40   : > { %499 = vperm.xlu0 %3009, %v356_v18  }
  0x47   : > { %509 = vperm.xlu1 %3010, %v358_v19   ;;  %417 = vperm.xlu2 %3011, %v343_v20  }
  0x48   : > { %504 = vperm.xlu0 %3009, %v357_v21   ;;  %v2616_v21 = vld [vmem:[%s3513_s24 + $0xd0] sm:$0xff] }
  0x4f   : > { %514 = vperm.xlu1 %3010, %v359_v22   ;;  %519 = vperm.xlu2 %3011, %v360_v23   ;;  %v2617_v22 = vld [vmem:[%s3513_s24 + $0xd8] sm:$0xff]  ;;  %v2631_v23 = vld [vmem:[%s3508_s21 + $0xc8] sm:$0xff] }
  0x50   : > { %422 = vperm.xlu0 %3009, %v344_v24  }
  0x57   : > { %432 = vperm.xlu1 %3010, %v346_v25   ;;  %524 = vperm.xlu2 %3011, %v361_v26  }
  0x58   : > { %427 = vperm.xlu0 %3009, %v345_v27  }
  0x5f   : > { %437 = vperm.xlu1 %3010, %v347_v28   ;;  %442 = vperm.xlu2 %3011, %v348_v29  }
  0x60   : > { %529 = vperm.xlu0 %3009, %v362_v30  }
  0x67   : > { %539 = vperm.xlu1 %3010, %v364_v32   ;;  %1356 = vperm.xlu2 %3011, %v2606_v33  }
  0x68   : > { %534 = vperm.xlu0 %3009, %v363_v35   ;;  %v2618_v35 = vld [vmem:[%s3513_s24 + $0xe0] sm:$0xff] }
  0x6f   : > { %1452 = vperm.xlu1 %3010, %v2622_v37   ;;  %1457 = vperm.xlu2 %3011, %v2623_v38  }
  0x70   : > { %1361 = vperm.xlu0 %3009, %v2607_v39  }
  0x71   : > { %v378_v47 = vpop.permute.xlu2 %377 }
  0x72   : > { %v448_v19 = vmul.f32 %v3587_v56, %v378_v47  ;;  %v2619_v47 = vld [vmem:[%s3513_s24 + $0xe8] sm:$0xff] }
  0x77   : > { %1371 = vperm.xlu1 %3010, %v2609_v42   ;;  %1462 = vperm.xlu2 %3011, %v2624_v43   ;;  %v2634_v43 = vld [vmem:[%s3508_s21 + $0xe0] sm:$0xff] }
  0x78   : > { %1366 = vperm.xlu0 %3009, %v2608_v44   ;;  %v2635_v44 = vld [vmem:[%s3508_s21 + $0xe8] sm:$0xff] }
  0x79   : > { %v383_v55 = vpop.permute.xlu2 %382 }
  0x7a   : > { %v449_v15 = vmul.f32 %v3587_v56, %v383_v55 }
  0x7f   : > { %1376 = vperm.xlu1 %3010, %v2610_v48   ;;  %1381 = vperm.xlu2 %3011, %v2611_v49  }
  0x80   : > { %1467 = vperm.xlu0 %3009, %v2625_v50  }
  0x81   : > { %v388_v1 = vpop.permute.xlu2 %387 }
  0x82   : > { %v450_v42 = vmul.f32 %v3587_v56, %v388_v1 }
  0x87   : > { %1477 = vperm.xlu1 %3010, %v2627_v52   ;;  %1386 = vperm.xlu2 %3011, %v2612_v53  }
  0x88   : > { %1472 = vperm.xlu0 %3009, %v2626_v54  }
  0x89   : > { %v465_v58 = vpop.permute.xlu1 %464  ;;  %v490_v16 = vpop.permute.xlu2 %489 }
  0x8a   : > { %v368_v59 = vpop.permute.xlu0 %367  ;;  %v543_v60 = vmul.f32 %v3592_v57, %v465_v58  ;;  %v548_v46 = vmul.f32 %v3592_v57, %v490_v16  ;;  %v2621_v58 = vld [vmem:[%s3513_s24 + $0xf8] sm:$0xff] }
  0x8b   : > { %v446_v61 = vmul.f32 %v3587_v56, %v368_v59  ;;  %v2636_v59 = vld [vmem:[%s3508_s21 + $0xf0] sm:$0xff] }
  0x8d   : > { %v559_v3 = vadd.f32 %v543_v60, %v446_v61  ;;  %v2620_v60 = vld [vmem:[%s3513_s24 + $0xf0] sm:$0xff]  ;;  %s313_s24 = sand.u32 1, %s3398_s28  }
  0x8e   : > { %s2390_s25 = sshll.u32 %s313_s24, 8  ;;  %s2297_s13 = scalar_lea.sflag [#allocation3], %s313_s24 }
  0x8f   : > { %1482 = vperm.xlu1 %3010, %v2628_v62   ;;  %1487 = vperm.xlu2 %3011, %v2629_v63   ;;  %v578_v8 = vadd.f32 %v3602_v2, %v559_v3  ;;  %s4051_s12 = scalar_lea.vmem [#allocation2], %s2390_s25  ;;  %s2308_s25 = scalar_lea.hbm %s4214_s8, %s2950_s22 }
  0x90   : > { %1391 = vperm.xlu0 %3009, %v2613_v0   ;;  %s2309_s26 = sshll.u32 %s4051_s12, 4  ;;  %s2311_s10 = sshll.u32 %s2308_s25, 4  ;;  %s2310_s26 = int_to_ptr.vmem [resolvable:$true] %s2309_s26  ;;  %s2312_s10 = int_to_ptr.hbm [resolvable:$true] %s2311_s10 }
  0x91   : > { %v470_v4 = vpop.permute.xlu1 %469  ;;  %3024 = vtanh.f32 %v578_v8  ;;  %v495_v33 = vpop.permute.xlu2 %494  ;;  %s3358_s9 = sshra.s32 %s2312_s10, 4  ;;  %s3359_s9 = int_to_ptr.hbm [resolvable:$true] %s3358_s9 }
  0x92   : > { %v544_v5 = vmul.f32 %v3592_v57, %v470_v4  ;;  %v373_v6 = vpop.permute.xlu0 %372  ;;  %s3360_s17 = scalar_lea.hbm %s3359_s9, 256  ;;  %p3365_p0 = scmp.lt.s32.totalorder %s3359_s9, %s4214_s8 }
  0x93   : > { %v447_v7 = vmul.f32 %v3587_v56, %v373_v6  ;;  %p3361_p11 = scmp.ne.s32.totalorder %s3359_s9, %s3360_s17  ;;  %p3366_p1 = scmp.lt.s32.totalorder %s3364_s20, %s3360_s17 }
  0x95   : > { %v560_v11 = vadd.f32 %v544_v5, %v447_v7  ;;  %p3362_p12 = pnand %p3361_p11, %p3494_p5  ;;  %p3367_p2 = por %p3366_p1, %p3365_p0 }
  0x97   : > { %v579_v13 = vadd.f32 %v3602_v2, %v560_v11  ;;  %1401 = vperm.xlu1 %3010, %v2615_v9   ;;  %1492 = vperm.xlu2 %3011, %v2630_v10   ;;  %v3025_v24 = vpop.eup %3024  ;;  %p3363_p13 = pneg %p3362_p12 }
  0x98   : > { %1396 = vperm.xlu0 %3009, %v2614_v12   ;;  %v2637_v12 = vld [vmem:[%s3508_s21 + $0xf8] sm:$0xff] }
  0x99   : > { %3026 = vtanh.f32 %v579_v13  ;;  %v480_v14 = vpop.permute.xlu1 %479  ;;  %v413_v48 = vpop.permute.xlu2 %412  ;;  %p3368_p3 = pnand %p3367_p2, %p3363_p13 }
  0x9a   : > { %v546_v17 = vmul.f32 %v3592_v57, %v480_v14  ;;  %v475_v18 = vpop.permute.xlu0 %474  ;;  %v455_v63 = vmul.f32 %v3587_v56, %v413_v48  ;;  %v549_v14 = vmul.f32 %v3592_v57, %v495_v33 }
  0x9b   : > { %v545_v20 = vmul.f32 %v3592_v57, %v475_v18 }
  0x9c   : > { %v562_v25 = vadd.f32 %v546_v17, %v449_v15 }
  0x9d   : > { %v561_v27 = vadd.f32 %v545_v20, %v448_v19 }
  0x9e   : > { %v581_v30 = vadd.f32 %v3602_v2, %v562_v25 }
  0x9f   : > { %v3027_v26 = vpop.eup %3026  ;;  %1406 = vperm.xlu1 %3010, %v2616_v21   ;;  %1411 = vperm.xlu2 %3011, %v2617_v22   ;;  %v580_v32 = vadd.f32 %v3602_v2, %v561_v27 }
  0xa0   : > { %1497 = vperm.xlu0 %3009, %v2631_v23   ;;  %v610_v28 = vpack.c.bf16 %v3027_v26, %v3025_v24  ;;  %3028 = vtanh.f32 %v581_v30 }
  0xa1   : > { %v485_v29 = vpop.permute.xlu1 %484  ;;  %3030 = vtanh.f32 %v580_v32  ;;  %v418_v61 = vpop.permute.xlu2 %417 }
  0xa2   : > { %694 = vmatmul.bf16.vlgmr.msra.gmra.mxu0 %v610_v28  ;;  %v393_v31 = vpop.permute.xlu0 %392  ;;  %v547_v38 = vmul.f32 %v3592_v57, %v485_v29  ;;  %v456_v25 = vmul.f32 %v3587_v56, %v418_v61 }
  0xa3   : > { %v451_v40 = vmul.f32 %v3587_v56, %v393_v31 }
  0xa4   : > { %v563_v49 = vadd.f32 %v547_v38, %v450_v42 }
  0xa5   : > { %v564_v50 = vadd.f32 %v548_v46, %v451_v40 }
  0xa6   : > { %v3029_v41 = vpop.eup %3028  ;;  %v582_v53 = vadd.f32 %v3602_v2, %v563_v49 }
  0xa7   : > { %1507 = vperm.xlu1 %3010, %v2633_v34   ;;  %1416 = vperm.xlu2 %3011, %v2618_v35   ;;  %v3031_v45 = vpop.eup %3030  ;;  %v583_v55 = vadd.f32 %v3602_v2, %v564_v50 }
  0xa8   : > { %1502 = vperm.xlu0 %3009, %v2632_v36   ;;  %v611_v51 = vpack.c.bf16 %v3029_v41, %v3031_v45  ;;  %3032 = vtanh.f32 %v582_v53 }
  0xa9   : > { %v403_v37 = vpop.permute.xlu1 %402  ;;  %3034 = vtanh.f32 %v583_v55  ;;  %v520_v20 = vpop.permute.xlu2 %519 }
  0xaa   : > { %v398_v39 = vpop.permute.xlu0 %397  ;;  %v453_v9 = vmul.f32 %v3587_v56, %v403_v37  ;;  %v554_v26 = vmul.f32 %v3592_v57, %v520_v20 }
  0xab   : > { %v452_v10 = vmul.f32 %v3587_v56, %v398_v39 }
  0xad   : > { %v565_v18 = vadd.f32 %v549_v14, %v452_v10  ;;  %v2884_v10 = vld [vmem:[%s4210_s4 + $0x70] sm:$0xff]  ;;  %v2881_v14 = vld [vmem:[%s4210_s4 + $0x58] sm:$0xff] }
  0xae   : > { %v3033_v6 = vpop.eup %3032 }
  0xaf   : > { %1512 = vperm.xlu1 %3010, %v2634_v43   ;;  %1517 = vperm.xlu2 %3011, %v2635_v44   ;;  %v3035_v8 = vpop.eup %3034  ;;  %v584_v27 = vadd.f32 %v3602_v2, %v565_v18 }
  0xb0   : > { %1421 = vperm.xlu0 %3009, %v2619_v47   ;;  %v612_v17 = vpack.c.bf16 %v3035_v8, %v3033_v6 }
  0xb1   : > { %v408_v52 = vpop.permute.xlu1 %407  ;;  %v525_v43 = vpop.permute.xlu2 %524 }
  0xb2   : > { %699 = vmatmul.bf16.gmra.mxu0 %v611_v51  ;;  %v500_v54 = vpop.permute.xlu0 %499  ;;  %v454_v3 = vmul.f32 %v3587_v56, %v408_v52  ;;  %v555_v48 = vmul.f32 %v3592_v57, %v525_v43  ;;  %v2911_v43 = vld [vmem:[%s4210_s4 + $0x8] sm:$0xff] }
  0xb3   : > { %v550_v4 = vmul.f32 %v3592_v57, %v500_v54 }
  0xb5   : > { %v566_v15 = vadd.f32 %v550_v4, %v453_v9 }
  0xb7   : > { %1431 = vperm.xlu1 %3010, %v2621_v58   ;;  %1522 = vperm.xlu2 %3011, %v2636_v59   ;;  %v585_v23 = vadd.f32 %v3602_v2, %v566_v15  ;;  %v2880_v15 = vld [vmem:[%s4210_s4 + $0x50] sm:$0xff] }
  0xb8   : > { %1426 = vperm.xlu0 %3009, %v2620_v60  }
  0xb9   : > { %v510_v62 = vpop.permute.xlu1 %509  ;;  %v443_v58 = vpop.permute.xlu2 %442 }
  0xba   : > { %v552_v0 = vmul.f32 %v3592_v57, %v510_v62  ;;  %v505_v1 = vpop.permute.xlu0 %504  ;;  %v461_v61 = vmul.f32 %v3587_v56, %v443_v58 }
  0xbb   : > { %v551_v5 = vmul.f32 %v3592_v57, %v505_v1 }
  0xbc   : > { %v568_v7 = vadd.f32 %v552_v0, %v455_v63 }
  0xbd   : > { %v567_v11 = vadd.f32 %v551_v5, %v454_v3 }
  0xbe   : > { %v587_v13 = vadd.f32 %v3602_v2, %v568_v7  ;;  %v2885_v7 = vld [vmem:[%s4210_s4 + $0x78] sm:$0xff] }
  0xbf   : > { %v586_v16 = vadd.f32 %v3602_v2, %v567_v11  ;;  %829 = vmatpush.bf16.msra.mxu1 %v2885_v7  ;;  %2959 = vmatpush.bf16.msra.mxu3 %v2885_v7 }
  0xc0   : > { %3036 = vtanh.f32 %v587_v13  ;;  %1527 = vperm.xlu0 %3009, %v2637_v12   ;;  %v2883_v12 = vld [vmem:[%s4210_s4 + $0x68] sm:$0xff]  ;;  %v2882_v13 = vld [vmem:[%s4210_s4 + $0x60] sm:$0xff] }
  0xc1   : > { %3038 = vtanh.f32 %v586_v16  ;;  %v515_v19 = vpop.permute.xlu1 %514  ;;  %v2879_v16 = vld [vmem:[%s4210_s4 + $0x48] sm:$0xff] }
  0xc2   : > { %v553_v21 = vmul.f32 %v3592_v57, %v515_v19  ;;  %704 = vmatmul.bf16.gmra.mxu0 %v612_v17  ;;  %v423_v22 = vpop.permute.xlu0 %422  ;;  %3040 = vtanh.f32 %v585_v23  ;;  %v2878_v17 = vld [vmem:[%s4210_s4 + $0x40] sm:$0xff] }
  0xc3   : > { %v457_v24 = vmul.f32 %v3587_v56, %v423_v22  ;;  %3042 = vtanh.f32 %v584_v27  ;;  %830 = vmatpush.bf16.msra.mxu1 %v2884_v10  ;;  %2960 = vmatpush.bf16.msra.mxu3 %v2884_v10  ;;  %v3693_v19 = vld [vmem:[%s4211_s5] ss:$0 sm:$0xff]  ;;  %v2917_v27 = vld [vmem:[%s4210_s4 + $0x38] sm:$0xff] }
  0xc4   : > { %v569_v29 = vadd.f32 %v553_v21, %v456_v25 }
  0xc5   : > { %v570_v31 = vadd.f32 %v554_v26, %v457_v24 }
  0xc6   : > { %v3037_v28 = vpop.eup %3036  ;;  %v588_v33 = vadd.f32 %v3602_v2, %v569_v29  ;;  %v2916_v29 = vld [vmem:[%s4210_s4 + $0x30] sm:$0xff] }
  0xc7   : > { %v3039_v30 = vpop.eup %3038  ;;  %v589_v35 = vadd.f32 %v3602_v2, %v570_v31  ;;  %831 = vmatpush.bf16.msra.mxu1 %v2883_v12  ;;  %2961 = vmatpush.bf16.msra.mxu3 %v2883_v12 }
  0xc8   : > { %v614_v32 = vpack.c.bf16 %v3037_v28, %v3039_v30  ;;  %v3041_v37 = vpop.eup %3040  ;;  %3044 = vtanh.f32 %v588_v33  ;;  %v2914_v33 = vld [vmem:[%s4210_s4 + $0x20] sm:$0xff] }
  0xc9   : > { %v433_v36 = vpop.permute.xlu1 %432  ;;  %v3043_v38 = vpop.eup %3042  ;;  %3046 = vtanh.f32 %v589_v35 }
  0xca   : > { %714 = vmatmul.bf16.vlgmr.msra.gmra.mxu2 %v614_v32  ;;  %v428_v34 = vpop.permute.xlu0 %427  ;;  %v613_v39 = vpack.c.bf16 %v3041_v37, %v3043_v38  ;;  %v459_v45 = vmul.f32 %v3587_v56, %v433_v36  ;;  %v2915_v32 = vld [vmem:[%s4210_s4 + $0x28] sm:$0xff]  ;;  %v2913_v38 = vld [vmem:[%s4210_s4 + $0x18] sm:$0xff] }
  0xcb   : > { %v458_v46 = vmul.f32 %v3587_v56, %v428_v34  ;;  %832 = vmatpush.bf16.msra.mxu1 %v2882_v13  ;;  %2962 = vmatpush.bf16.msra.mxu3 %v2882_v13 }
  0xcd   : > { %v571_v51 = vadd.f32 %v555_v48, %v458_v46 }
  0xce   : > { %v3045_v42 = vpop.eup %3044 }
  0xcf   : > { %v3047_v44 = vpop.eup %3046  ;;  %v590_v53 = vadd.f32 %v3602_v2, %v571_v51  ;;  %833 = vmatpush.bf16.msra.mxu1 %v2881_v14  ;;  %2963 = vmatpush.bf16.msra.mxu3 %v2881_v14 }
  0xd0   : > { %v615_v50 = vpack.c.bf16 %v3047_v44, %v3045_v42 }
  0xd1   : > { %v438_v47 = vpop.permute.xlu1 %437 }
  0xd2   : > { %709 = vmatmul.bf16.gmra.mxu0 %v613_v39  ;;  %v530_v40 = vpop.permute.xlu0 %529  ;;  %v460_v63 = vmul.f32 %v3587_v56, %v438_v47  ;;  %v1357_v47 = vpop.permute.xlu2 %1356 }
  0xd3   : > { %v556_v41 = vmul.f32 %v3592_v57, %v530_v40  ;;  %834 = vmatpush.bf16.msra.mxu1 %v2880_v15  ;;  %2964 = vmatpush.bf16.msra.mxu3 %v2880_v15  ;;  %v2912_v40 = vld [vmem:[%s4210_s4 + $0x10] sm:$0xff] }
  0xd5   : > { %v572_v49 = vadd.f32 %v556_v41, %v459_v45  ;;  %v2910_v45 = vld [vmem:[%s4210_s4] sm:$0xff] }
  0xd7   : > { %v591_v52 = vadd.f32 %v3602_v2, %v572_v49  ;;  %835 = vmatpush.bf16.msra.mxu1 %v2879_v16  ;;  %2965 = vmatpush.bf16.msra.mxu3 %v2879_v16 }
  0xd9   : > { %3048 = vtanh.f32 %v591_v52  ;;  %v540_v54 = vpop.permute.xlu1 %539 }
  0xda   : > { %719 = vmatmul.bf16.gmra.mxu2 %v615_v50  ;;  %v535_v55 = vpop.permute.xlu0 %534  ;;  %3050 = vtanh.f32 %v590_v53  ;;  %v558_v59 = vmul.f32 %v3592_v57, %v540_v54 }
  0xdb   : > { %v557_v60 = vmul.f32 %v3592_v57, %v535_v55  ;;  %836 = vmatpush.bf16.msra.mxu1 %v2878_v17  ;;  %2966 = vmatpush.bf16.msra.mxu3 %v2878_v17  ;;  %v2893_v17 = vld [vmem:[%s4210_s4 + $0xb8] sm:$0xff] }
  0xdc   : > { %v574_v0 = vadd.f32 %v558_v59, %v461_v61  ;;  %v1458_v61 = vpop.permute.xlu2 %1457  ;;  %972 = vmatpush.bf16.msrb.mxu2 %v2893_v17 }
  0xdd   : > { %v573_v3 = vadd.f32 %v557_v60, %v460_v63 }
  0xde   : > { %v593_v5 = vadd.f32 %v3602_v2, %v574_v0  ;;  %v1434_v0 = vmul.f32 %v3587_v56, %v1357_v47 }
  0xdf   : > { %v3049_v62 = vpop.eup %3048  ;;  %v592_v6 = vadd.f32 %v3602_v2, %v573_v3  ;;  %1670 = vmatpush.bf16.msrb.mxu1 %v2917_v27 }
  0xe0   : > { %v3051_v1 = vpop.eup %3050  ;;  %3052 = vtanh.f32 %v593_v5 }
  0xe1   : > { %v616_v4 = vpack.c.bf16 %v3049_v62, %v3051_v1  ;;  %3054 = vtanh.f32 %v592_v6  ;;  %v1453_v55 = vpop.permute.xlu1 %1452  ;;  %v1531_v1 = vmul.f32 %v3592_v57, %v1458_v61 }
  0xe2   : > { %v1362_v51 = vpop.permute.xlu0 %1361  ;;  %v1530_v62 = vmul.f32 %v3592_v57, %v1453_v55 }
  0xe3   : > { %1671 = vmatpush.bf16.msrb.mxu1 %v2916_v29  ;;  %v1435_v63 = vmul.f32 %v3587_v56, %v1362_v51 }
  0xe4   : > { %v1463_v29 = vpop.permute.xlu2 %1462 }
  0xe6   : > { %v3053_v8 = vpop.eup %3052 }
  0xe7   : > { %v3055_v9 = vpop.eup %3054  ;;  %1672 = vmatpush.bf16.msrb.mxu1 %v2915_v32 }
  0xe8   : > { %v617_v11 = vpack.c.bf16 %v3053_v8, %v3055_v9  ;;  %v1547_v8 = vadd.f32 %v1531_v1, %v1435_v63 }
  0xe9   : > { %v1372_v15 = vpop.permute.xlu1 %1371 }
  0xea   : > { %724 = vmatmul.bf16.gmra.mxu2 %v616_v4  ;;  %v1546_v4 = vadd.f32 %v1530_v62, %v1434_v0  ;;  %v1367_v5 = vpop.permute.xlu0 %1366  ;;  %v1563_v14 = vadd.f32 %v3602_v2, %v1547_v8 }
  0xeb   : > { %1673 = vmatpush.bf16.msrb.mxu1 %v2914_v33  ;;  %v1436_v32 = vmul.f32 %v3587_v56, %v1367_v5 }
  0xec   : > { %v1562_v12 = vadd.f32 %v3602_v2, %v1546_v4  ;;  %v2889_v4 = vld [vmem:[%s4210_s4 + $0x98] sm:$0xff] }
  0xef   : > { %1674 = vmatpush.bf16.msrb.mxu1 %v2913_v38 }
  0xf1   : > { %v1377_v27 = vpop.permute.xlu1 %1376 }
  0xf3   : > { %1675 = vmatpush.bf16.msrb.mxu1 %v2912_v40  ;;  %v2891_v40 = vld [vmem:[%s4210_s4 + $0xa8] sm:$0xff] }
  0xf7   : > { %1676 = vmatpush.bf16.msrb.mxu1 %v2911_v43 }
  0xfa   : > { %729 = vmatmul.bf16.gmra.mxu2 %v617_v11 }
  0xfb   : > { %1677 = vmatpush.bf16.msrb.mxu1 %v2910_v45 }
 0x11f   : > { %v695_v18 = vpop.f32.mrf.mxu0 }
 0x120   : > { %v696_v20 = vadd.f32 %v3693_v19, %v695_v18 }
 0x122   : > { %3056 = vtanh.f32 %v696_v20 }
 0x127   : > { %v697_v21 = vpop.f32.mrf.mxu0 }
 0x128   : > { %v698_v22 = vadd.f32 %v3693_v19, %v697_v21  ;;  %v3057_v23 = vpop.eup %3056  ;;  %v1468_v21 = vpop.permute.xlu0 %1467 }
 0x12a   : > { %3058 = vtanh.f32 %v698_v22  ;;  %v2892_v22 = vld [vmem:[%s4210_s4 + $0xb0] sm:$0xff] }
 0x12b   : > { %973 = vmatpush.bf16.msrb.mxu2 %v2892_v22 }
 0x12f   : > { %v700_v24 = vpop.f32.mrf.mxu0  ;;  %974 = vmatpush.bf16.msrb.mxu2 %v2891_v40 }
 0x130   : > { %v3059_v25 = vpop.eup %3058  ;;  %v701_v28 = vadd.f32 %v3693_v19, %v700_v24  ;;  %v1473_v47 = vpop.permute.xlu0 %1472 }
 0x131   : > { %v751_v26 = vpack.c.bf16 %v3059_v25, %v3057_v23  ;;  %v1533_v23 = vmul.f32 %v3592_v57, %v1468_v21 }
 0x132   : > { %3060 = vtanh.f32 %v701_v28 }
 0x133   : > { %837 = vmatmul.bf16.vlgmr.msra.gmra.mxu1 %v751_v26  ;;  %v1437_v26 = vmul.f32 %v3587_v56, %v1372_v15 }
 0x135   : > { %v1549_v33 = vadd.f32 %v1533_v23, %v1437_v26 }
 0x137   : > { %v702_v30 = vpop.f32.mrf.mxu0  ;;  %v1565_v38 = vadd.f32 %v3602_v2, %v1549_v33 }
 0x138   : > { %v703_v31 = vadd.f32 %v3693_v19, %v702_v30  ;;  %v3061_v34 = vpop.eup %3060  ;;  %v1392_v5 = vpop.permute.xlu0 %1391 }
 0x13a   : > { %3062 = vtanh.f32 %v703_v31 }
 0x13f   : > { %v705_v35 = vpop.f32.mrf.mxu0 }
 0x140   : > { %v3063_v36 = vpop.eup %3062  ;;  %v706_v39 = vadd.f32 %v3693_v19, %v705_v35  ;;  %v1532_v35 = vmul.f32 %v3592_v57, %v1463_v29  ;;  %v1397_v21 = vpop.permute.xlu0 %1396  ;;  %v2886_v29 = vld [vmem:[%s4210_s4 + $0x80] sm:$0xff] }
 0x141   : > { %v752_v37 = vpack.c.bf16 %v3063_v36, %v3061_v34 }
 0x142   : > { %3064 = vtanh.f32 %v706_v39 }
 0x143   : > { %842 = vmatmul.bf16.gmra.mxu1 %v752_v37  ;;  %v1548_v37 = vadd.f32 %v1532_v35, %v1436_v32  ;;  %v1442_v35 = vmul.f32 %v3587_v56, %v1397_v21 }
 0x145   : > { %v1564_v43 = vadd.f32 %v3602_v2, %v1548_v37 }
 0x147   : > { %v707_v41 = vpop.f32.mrf.mxu0 }
 0x148   : > { %v708_v42 = vadd.f32 %v3693_v19, %v707_v41  ;;  %v3065_v46 = vpop.eup %3064 }
 0x14a   : > { %3066 = vtanh.f32 %v708_v42  ;;  %v2890_v42 = vld [vmem:[%s4210_s4 + $0xa0] sm:$0xff] }
 0x14b   : > { %975 = vmatpush.bf16.msrb.mxu2 %v2890_v42  ;;  %v2925_v42 = vld [vmem:[%s4210_s4 + $0x78] sm:$0xff] }
 0x14d   : > { %v715_v44 = vpop.f32.mrf.mxu2 }
 0x14e   : > { %v716_v52 = vadd.f32 %v3693_v19, %v715_v44  ;;  %v1478_v44 = vpop.permute.xlu1 %1477 }
 0x14f   : > { %v710_v48 = vpop.f32.mrf.mxu0  ;;  %976 = vmatpush.bf16.msrb.mxu2 %v2889_v4 }
 0x150   : > { %v3067_v49 = vpop.eup %3066  ;;  %v711_v53 = vadd.f32 %v3693_v19, %v710_v48  ;;  %3068 = vtanh.f32 %v716_v52  ;;  %v1535_v48 = vmul.f32 %v3592_v57, %v1478_v44  ;;  %v1438_v52 = vmul.f32 %v3587_v56, %v1377_v27 }
 0x151   : > { %v753_v50 = vpack.c.bf16 %v3067_v49, %v3065_v46  ;;  %v1382_v46 = vpop.permute.xlu2 %1381  ;;  %v1534_v49 = vmul.f32 %v3592_v57, %v1473_v47 }
 0x153   : > { %847 = vmatmul.bf16.gmra.mxu1 %v753_v50  ;;  %v1439_v50 = vmul.f32 %v3587_v56, %v1382_v46 }
 0x155   : > { %v717_v54 = vpop.f32.mrf.mxu2 }
 0x156   : > { %v718_v58 = vadd.f32 %v3693_v19, %v717_v54  ;;  %v3069_v3 = vpop.eup %3068  ;;  %v1551_v54 = vadd.f32 %v1535_v48, %v1439_v50 }
 0x157   : > { %v712_v59 = vpop.f32.mrf.mxu0 }
 0x158   : > { %3070 = vtanh.f32 %v718_v58  ;;  %v713_v60 = vadd.f32 %v3693_v19, %v712_v59  ;;  %v1550_v59 = vadd.f32 %v1534_v49, %v1438_v52  ;;  %v1567_v63 = vadd.f32 %v3602_v2, %v1551_v54 }
 0x159   : > { %3072 = vtanh.f32 %v711_v53  ;;  %v1387_v62 = vpop.permute.xlu2 %1386 }
 0x15a   : > { %3074 = vtanh.f32 %v713_v60  ;;  %v1566_v1 = vadd.f32 %v3602_v2, %v1550_v59 }
 0x15b   : > { %3076 = vtanh.f32 %v1562_v12 }
 0x15c   : > { %3078 = vtanh.f32 %v1563_v14  ;;  %v1441_v14 = vmul.f32 %v3587_v56, %v1392_v5 }
 0x15d   : > { %v720_v6 = vpop.f32.mrf.mxu2 }
 0x15e   : > { %v3071_v7 = vpop.eup %3070  ;;  %v721_v16 = vadd.f32 %v3693_v19, %v720_v6 }
 0x15f   : > { %v3073_v9 = vpop.eup %3072  ;;  %v755_v10 = vpack.c.bf16 %v3071_v7, %v3069_v3  ;;  %v2888_v7 = vld [vmem:[%s4210_s4 + $0x90] sm:$0xff] }
 0x160   : > { %v3075_v11 = vpop.eup %3074  ;;  %3080 = vtanh.f32 %v721_v16  ;;  %977 = vmatpush.bf16.msrb.mxu2 %v2888_v7  ;;  %v1440_v16 = vmul.f32 %v3587_v56, %v1387_v62 }
 0x161   : > { %857 = vmatmul.bf16.vlgmr.msra.gmra.mxu3 %v755_v10  ;;  %v754_v13 = vpack.c.bf16 %v3075_v11, %v3073_v9  ;;  %v3077_v24 = vpop.eup %3076  ;;  %v1483_v9 = vpop.permute.xlu1 %1482 }
 0x162   : > { %v3079_v25 = vpop.eup %3078  ;;  %v1488_v11 = vpop.permute.xlu2 %1487  ;;  %v1536_v12 = vmul.f32 %v3592_v57, %v1483_v9 }
 0x163   : > { %852 = vmatmul.bf16.gmra.mxu1 %v754_v13  ;;  %v1594_v36 = vpack.c.bf16 %v3079_v25, %v3077_v24  ;;  %v2887_v25 = vld [vmem:[%s4210_s4 + $0x88] sm:$0xff] }
 0x164   : > { %978 = vmatpush.bf16.msrb.mxu2 %v2887_v25 }
 0x165   : > { %v722_v18 = vpop.f32.mrf.mxu2 }
 0x166   : > { %v723_v20 = vadd.f32 %v3693_v19, %v722_v18  ;;  %v3081_v28 = vpop.eup %3080  ;;  %v1537_v18 = vmul.f32 %v3592_v57, %v1488_v11 }
 0x168   : > { %3082 = vtanh.f32 %v723_v20  ;;  %v1552_v20 = vadd.f32 %v1536_v12, %v1440_v16  ;;  %v1553_v22 = vadd.f32 %v1537_v18, %v1441_v14  ;;  %979 = vmatpush.bf16.msrb.mxu2 %v2886_v29 }
 0x169   : > { %3084 = vtanh.f32 %v1565_v38  ;;  %v1402_v27 = vpop.permute.xlu1 %1401 }
 0x16a   : > { %v1568_v24 = vadd.f32 %v3602_v2, %v1552_v20  ;;  %v1569_v26 = vadd.f32 %v3602_v2, %v1553_v22  ;;  %v1493_v32 = vpop.permute.xlu2 %1492 }
 0x16b   : > { %v1538_v37 = vmul.f32 %v3592_v57, %v1493_v32 }
 0x16c   : > { %1811 = vmatpush.bf16.msra.mxu2 %v2925_v42 }
 0x16d   : > { %v725_v30 = vpop.f32.mrf.mxu2  ;;  %v1554_v40 = vadd.f32 %v1538_v37, %v1442_v35 }
 0x16e   : > { %v3083_v31 = vpop.eup %3082  ;;  %v726_v39 = vadd.f32 %v3693_v19, %v725_v30 }
 0x16f   : > { %v756_v34 = vpack.c.bf16 %v3083_v31, %v3081_v28  ;;  %v3085_v51 = vpop.eup %3084  ;;  %v1498_v28 = vpop.permute.xlu0 %1497 }
 0x170   : > { %3086 = vtanh.f32 %v726_v39  ;;  %v1539_v30 = vmul.f32 %v3592_v57, %v1498_v28 }
 0x171   : > { %862 = vmatmul.bf16.gmra.mxu3 %v756_v34  ;;  %v1443_v34 = vmul.f32 %v3587_v56, %v1402_v27 }
 0x172   : > { %v1412_v44 = vpop.permute.xlu2 %1411 }
 0x173   : > { %1678 = vmatmul.bf16.vlgmr.msrb.gmra.mxu1 %v1594_v36  ;;  %v1407_v36 = vpop.permute.xlu1 %1406  ;;  %v1555_v38 = vadd.f32 %v1539_v30, %v1443_v34  ;;  %v1445_v49 = vmul.f32 %v3587_v56, %v1412_v44 }
 0x175   : > { %v727_v41 = vpop.f32.mrf.mxu2 }
 0x176   : > { %v728_v45 = vadd.f32 %v3693_v19, %v727_v41  ;;  %v3087_v53 = vpop.eup %3086  ;;  %v1571_v41 = vadd.f32 %v3602_v2, %v1555_v38 }
 0x177   : > { %v1503_v46 = vpop.permute.xlu0 %1502 }
 0x178   : > { %3088 = vtanh.f32 %v728_v45  ;;  %v1540_v48 = vmul.f32 %v3592_v57, %v1503_v46 }
 0x179   : > { %3090 = vtanh.f32 %v1564_v43  ;;  %v1570_v43 = vadd.f32 %v3602_v2, %v1554_v40 }
 0x17a   : > { %3092 = vtanh.f32 %v1567_v63  ;;  %v2924_v63 = vld [vmem:[%s4210_s4 + $0x70] sm:$0xff] }
 0x17b   : > { %3094 = vtanh.f32 %v1566_v1  ;;  %v1508_v45 = vpop.permute.xlu1 %1507  ;;  %1812 = vmatpush.bf16.msra.mxu2 %v2924_v63 }
 0x17c   : > { %v1541_v47 = vmul.f32 %v3592_v57, %v1508_v45 }
 0x17d   : > { %v730_v55 = vpop.f32.mrf.mxu2 }
 0x17e   : > { %v3089_v58 = vpop.eup %3088  ;;  %v731_v3 = vadd.f32 %v3693_v19, %v730_v55  ;;  %v1557_v52 = vadd.f32 %v1541_v47, %v1445_v49 }
 0x17f   : > { %v757_v60 = vpack.c.bf16 %v3089_v58, %v3087_v53  ;;  %v3091_v61 = vpop.eup %3090  ;;  %v1417_v58 = vpop.permute.xlu2 %1416 }
 0x180   : > { %v1595_v0 = vpack.c.bf16 %v3085_v51, %v3091_v61  ;;  %3096 = vtanh.f32 %v731_v3  ;;  %v3093_v10 = vpop.eup %3092  ;;  %v1444_v51 = vmul.f32 %v3587_v56, %v1407_v36  ;;  %v1573_v61 = vadd.f32 %v3602_v2, %v1557_v52 }
 0x181   : > { %867 = vmatmul.bf16.gmra.mxu3 %v757_v60  ;;  %v3095_v13 = vpop.eup %3094  ;;  %v3799_v60 = vld [vmem:[%s4211_s5 + $0x1] ss:$0 sm:$0xff] }
 0x182   : > { %v1596_v23 = vpack.c.bf16 %v3093_v10, %v3095_v13  ;;  %v1556_v54 = vadd.f32 %v1540_v48, %v1444_v51  ;;  %v1446_v10 = vmul.f32 %v3587_v56, %v1417_v58 }
 0x183   : > { %1683 = vmatmul.bf16.gmra.mxu1 %v1595_v0  ;;  %v1422_v0 = vpop.permute.xlu0 %1421  ;;  %v1513_v3 = vpop.permute.xlu1 %1512 }
 0x184   : > { %v1572_v62 = vadd.f32 %v3602_v2, %v1556_v54  ;;  %v1542_v7 = vmul.f32 %v3592_v57, %v1513_v3 }
 0x185   : > { %v732_v6 = vpop.f32.mrf.mxu2 }
 0x186   : > { %v733_v8 = vadd.f32 %v3693_v19, %v732_v6  ;;  %v3097_v15 = vpop.eup %3096  ;;  %v1558_v13 = vadd.f32 %v1542_v7, %v1446_v10 }
 0x187   : > { %v1518_v6 = vpop.permute.xlu2 %1517 }
 0x188   : > { %3098 = vtanh.f32 %v733_v8  ;;  %v1447_v8 = vmul.f32 %v3587_v56, %v1422_v0  ;;  %v1543_v12 = vmul.f32 %v3592_v57, %v1518_v6  ;;  %v2901_v6 = vld [vmem:[%s4210_s4 + $0xf8] sm:$0xff] }
 0x189   : > { %3100 = vtanh.f32 %v1568_v24  ;;  %v2923_v24 = vld [vmem:[%s4210_s4 + $0x68] sm:$0xff]  ;;  %1115 = vmatpush.bf16.msrb.mxu3 %v2901_v6 }
 0x18a   : > { %3102 = vtanh.f32 %v1569_v26  ;;  %v1559_v16 = vadd.f32 %v1543_v12, %v1447_v8  ;;  %1813 = vmatpush.bf16.msra.mxu2 %v2923_v24 }
 0x18b   : > { %3104 = vtanh.f32 %v1571_v41  ;;  %v1427_v14 = vpop.permute.xlu0 %1426  ;;  %v1432_v28 = vpop.permute.xlu1 %1431 }
 0x18c   : > { %3106 = vtanh.f32 %v1570_v43  ;;  %v1575_v22 = vadd.f32 %v3602_v2, %v1559_v16  ;;  %v1448_v32 = vmul.f32 %v3587_v56, %v1427_v14  ;;  %v1449_v34 = vmul.f32 %v3587_v56, %v1432_v28  ;;  %v2922_v56 = vld [vmem:[%s4210_s4 + $0x60] sm:$0xff]  ;;  %v2899_v16 = vld [vmem:[%s4210_s4 + $0xe8] sm:$0xff]  ;;  %v2897_v28 = vld [vmem:[%s4210_s4 + $0xd8] sm:$0xff] }
 0x18d   : > { %3108 = vtanh.f32 %v1573_v61 }
 0x18e   : > { %v3099_v17 = vpop.eup %3098  ;;  %3110 = vtanh.f32 %v1572_v62  ;;  %1814 = vmatpush.bf16.msra.mxu2 %v2922_v56  ;;  %v2933_v56 = vld [vmem:[%s4210_s4 + $0xb8] sm:$0xff] }
 0x18f   : > { %v758_v19 = vpack.c.bf16 %v3099_v17, %v3097_v15  ;;  %v3101_v31 = vpop.eup %3100  ;;  %v1523_v29 = vpop.permute.xlu2 %1522 }
 0x190   : > { %v3103_v33 = vpop.eup %3102  ;;  %v1544_v35 = vmul.f32 %v3592_v57, %v1523_v29 }
 0x191   : > { %872 = vmatmul.bf16.gmra.mxu3 %v758_v19  ;;  %v1597_v39 = vpack.c.bf16 %v3103_v33, %v3101_v31  ;;  %v3105_v50 = vpop.eup %3104  ;;  %v1574_v19 = vadd.f32 %v3602_v2, %v1558_v13  ;;  %v2919_v13 = vld [vmem:[%s4210_s4 + $0x48] sm:$0xff] }
 0x192   : > { %v3107_v53 = vpop.eup %3106  ;;  %v1560_v40 = vadd.f32 %v1544_v35, %v1448_v32 }
 0x193   : > { %1688 = vmatmul.bf16.gmra.mxu1 %v1596_v23  ;;  %v1598_v59 = vpack.c.bf16 %v3105_v50, %v3107_v53  ;;  %v3109_v9 = vpop.eup %3108  ;;  %v1528_v26 = vpop.permute.xlu0 %1527 }
 0x194   : > { %v3111_v11 = vpop.eup %3110  ;;  %v1545_v30 = vmul.f32 %v3592_v57, %v1528_v26  ;;  %v1576_v44 = vadd.f32 %v3602_v2, %v1560_v40 }
 0x195   : > { %v1599_v20 = vpack.c.bf16 %v3109_v9, %v3111_v11  ;;  %v2900_v11 = vld [vmem:[%s4210_s4 + $0xf0] sm:$0xff] }
 0x196   : > { %v1561_v37 = vadd.f32 %v1545_v30, %v1449_v34  ;;  %1116 = vmatpush.bf16.msrb.mxu3 %v2900_v11  ;;  %v2896_v34 = vld [vmem:[%s4210_s4 + $0xd0] sm:$0xff] }
 0x198   : > { %v1577_v43 = vadd.f32 %v3602_v2, %v1561_v37 }
 0x19a   : > { %1117 = vmatpush.bf16.msrb.mxu3 %v2899_v16 }
 0x1a3   : > { %1693 = vmatmul.bf16.gmra.mxu1 %v1597_v39 }
 0x1b0   : > { %v838_v55 = vpop.f32.mrf.mxu1 }
 0x1b1   : > { %v839_v1 = vadd.f32 %v3799_v60, %v838_v55  ;;  %v2921_v55 = vld [vmem:[%s4210_s4 + $0x58] sm:$0xff] }
 0x1b2   : > { %1815 = vmatpush.bf16.msra.mxu2 %v2921_v55 }
 0x1b3   : > { %1698 = vmatmul.bf16.gmra.mxu1 %v1598_v59  ;;  %3112 = vtanh.f32 %v839_v1 }
 0x1b8   : > { %v840_v4 = vpop.f32.mrf.mxu1 }
 0x1b9   : > { %v841_v5 = vadd.f32 %v3799_v60, %v840_v4  ;;  %v3113_v15 = vpop.eup %3112 }
 0x1bb   : > { %3114 = vtanh.f32 %v841_v5  ;;  %v2920_v5 = vld [vmem:[%s4210_s4 + $0x50] sm:$0xff] }
 0x1bc   : > { %3116 = vtanh.f32 %v1574_v19  ;;  %1816 = vmatpush.bf16.msra.mxu2 %v2920_v5 }
 0x1bd   : > { %3118 = vtanh.f32 %v1575_v22  ;;  %v2898_v22 = vld [vmem:[%s4210_s4 + $0xe0] sm:$0xff] }
 0x1be   : > { %1118 = vmatpush.bf16.msrb.mxu3 %v2898_v22  ;;  %v2930_v22 = vld [vmem:[%s4210_s4 + $0xa0] sm:$0xff] }
 0x1c0   : > { %v843_v17 = vpop.f32.mrf.mxu1  ;;  %1817 = vmatpush.bf16.msra.mxu2 %v2919_v13 }
 0x1c1   : > { %v3115_v18 = vpop.eup %3114  ;;  %v844_v23 = vadd.f32 %v3799_v60, %v843_v17 }
 0x1c2   : > { %v894_v21 = vpack.c.bf16 %v3115_v18, %v3113_v15  ;;  %v3117_v31 = vpop.eup %3116  ;;  %1119 = vmatpush.bf16.msrb.mxu3 %v2897_v28 }
 0x1c3   : > { %1703 = vmatmul.bf16.gmra.mxu1 %v1599_v20  ;;  %3120 = vtanh.f32 %v844_v23  ;;  %v3119_v33 = vpop.eup %3118  ;;  %v2918_v23 = vld [vmem:[%s4210_s4 + $0x40] sm:$0xff] }
 0x1c4   : > { %980 = vmatmul.bf16.vlgmr.msrb.gmra.mxu2 %v894_v21  ;;  %v1600_v41 = vpack.c.bf16 %v3119_v33, %v3117_v31 }
 0x1c5   : > { %1818 = vmatpush.bf16.msra.mxu2 %v2918_v23 }
 0x1c6   : > { %1120 = vmatpush.bf16.msrb.mxu3 %v2896_v34 }
 0x1c8   : > { %v845_v25 = vpop.f32.mrf.mxu1 }
 0x1c9   : > { %v846_v27 = vadd.f32 %v3799_v60, %v845_v25  ;;  %v3121_v36 = vpop.eup %3120 }
 0x1cb   : > { %3122 = vtanh.f32 %v846_v27 }
 0x1cc   : > { %3124 = vtanh.f32 %v1577_v43 }
 0x1cd   : > { %3126 = vtanh.f32 %v1576_v44 }
 0x1d0   : > { %v848_v38 = vpop.f32.mrf.mxu1 }
 0x1d1   : > { %v3123_v39 = vpop.eup %3122  ;;  %v849_v45 = vadd.f32 %v3799_v60, %v848_v38  ;;  %v2895_v38 = vld [vmem:[%s4210_s4 + $0xc8] sm:$0xff] }
 0x1d2   : > { %v895_v42 = vpack.c.bf16 %v3123_v39, %v3121_v36  ;;  %v3125_v47 = vpop.eup %3124  ;;  %1121 = vmatpush.bf16.msrb.mxu3 %v2895_v38 }
 0x1d3   : > { %1708 = vmatmul.bf16.gmra.mxu1 %v1600_v41  ;;  %3128 = vtanh.f32 %v849_v45  ;;  %v3127_v48 = vpop.eup %3126 }
 0x1d4   : > { %985 = vmatmul.bf16.gmra.mxu2 %v895_v42  ;;  %v1601_v2 = vpack.c.bf16 %v3125_v47, %v3127_v48  ;;  %v3876_v42 = vld [vmem:[%s4211_s5] ss:$0 sm:$0xff] }
 0x1d8   : > { %v850_v57 = vpop.f32.mrf.mxu1 }
 0x1d9   : > { %v851_v46 = vadd.f32 %v3799_v60, %v850_v57  ;;  %v3129_v49 = vpop.eup %3128 }
 0x1db   : > { %3130 = vtanh.f32 %v851_v46 }
 0x1e0   : > { %v853_v50 = vpop.f32.mrf.mxu1 }
 0x1e1   : > { %v3131_v51 = vpop.eup %3130  ;;  %v854_v54 = vadd.f32 %v3799_v60, %v853_v50 }
 0x1e2   : > { %v896_v52 = vpack.c.bf16 %v3131_v51, %v3129_v49 }
 0x1e3   : > { %1713 = vmatmul.bf16.gmra.mxu1 %v1601_v2  ;;  %3132 = vtanh.f32 %v854_v54 }
 0x1e4   : > { %v858_v53 = vpop.f32.mrf.mxu3  ;;  %990 = vmatmul.bf16.gmra.mxu2 %v896_v52  ;;  %v3891_v52 = vld [vmem:[%s4211_s5 + $0x2] ss:$0 sm:$0xff] }
 0x1e5   : > { %v859_v4 = vadd.f32 %v3799_v60, %v858_v53  ;;  %v2932_v53 = vld [vmem:[%s4210_s4 + $0xb0] sm:$0xff] }
 0x1e8   : > { %v855_v58 = vpop.f32.mrf.mxu1 }
 0x1e9   : > { %v856_v59 = vadd.f32 %v3799_v60, %v855_v58  ;;  %v3133_v62 = vpop.eup %3132 }
 0x1eb   : > { %3134 = vtanh.f32 %v856_v59 }
 0x1ec   : > { %v860_v61 = vpop.f32.mrf.mxu3 }
 0x1ed   : > { %v861_v3 = vadd.f32 %v3799_v60, %v860_v61 }
 0x1ef   : > { %3136 = vtanh.f32 %v861_v3 }
 0x1f0   : > { %3138 = vtanh.f32 %v859_v4  ;;  %v1679_v17 = vpop.f32.mrf.mxu1 }
 0x1f1   : > { %v3135_v63 = vpop.eup %3134  ;;  %v1680_v45 = vadd.f32 %v3876_v42, %v1679_v17 }
 0x1f2   : > { %v897_v0 = vpack.c.bf16 %v3135_v63, %v3133_v62 }
 0x1f4   : > { %v863_v1 = vpop.f32.mrf.mxu3  ;;  %995 = vmatmul.bf16.gmra.mxu2 %v897_v0 }
 0x1f5   : > { %v3137_v8 = vpop.eup %3136  ;;  %v864_v15 = vadd.f32 %v3799_v60, %v863_v1 }
 0x1f6   : > { %v3139_v9 = vpop.eup %3138 }
 0x1f7   : > { %v898_v10 = vpack.c.bf16 %v3137_v8, %v3139_v9 }
 0x1f8   : > { %v1681_v25 = vpop.f32.mrf.mxu1 }
 0x1f9   : > { %v1682_v44 = vadd.f32 %v3876_v42, %v1681_v25 }
 0x1fc   : > { %v865_v7 = vpop.f32.mrf.mxu3 }
 0x1fd   : > { %v866_v14 = vadd.f32 %v3799_v60, %v865_v7  ;;  %v2931_v7 = vld [vmem:[%s4210_s4 + $0xa8] sm:$0xff] }
 0x1ff   : > { %3140 = vtanh.f32 %v866_v14 }
 0x200   : > { %3142 = vtanh.f32 %v864_v15  ;;  %v1684_v30 = vpop.f32.mrf.mxu1 }
 0x201   : > { %v1685_v50 = vadd.f32 %v3876_v42, %v1684_v30 }
 0x204   : > { %v868_v12 = vpop.f32.mrf.mxu3  ;;  %1000 = vmatmul.bf16.gmra.mxu2 %v898_v10 }
 0x205   : > { %v3141_v20 = vpop.eup %3140  ;;  %v869_v26 = vadd.f32 %v3799_v60, %v868_v12 }
 0x206   : > { %v3143_v21 = vpop.eup %3142 }
 0x207   : > { %v899_v19 = vpack.c.bf16 %v3141_v20, %v3143_v21 }
 0x208   : > { %v1686_v37 = vpop.f32.mrf.mxu1 }
 0x209   : > { %v1687_v49 = vadd.f32 %v3876_v42, %v1686_v37  ;;  %v2929_v37 = vld [vmem:[%s4210_s4 + $0x98] sm:$0xff] }
 0x20c   : > { %v870_v18 = vpop.f32.mrf.mxu3 }
 0x20d   : > { %v871_v24 = vadd.f32 %v3799_v60, %v870_v18 }
 0x20f   : > { %3144 = vtanh.f32 %v871_v24 }
 0x210   : > { %3146 = vtanh.f32 %v869_v26  ;;  %v1689_v43 = vpop.f32.mrf.mxu1 }
 0x211   : > { %v1690_v3 = vadd.f32 %v3876_v42, %v1689_v43 }
 0x214   : > { %1005 = vmatmul.bf16.gmra.mxu2 %v899_v19  ;;  %v873_v27 = vpop.f32.mrf.mxu3 }
 0x215   : > { %v3145_v29 = vpop.eup %3144  ;;  %v874_v36 = vadd.f32 %v3799_v60, %v873_v27 }
 0x216   : > { %v3147_v31 = vpop.eup %3146 }
 0x217   : > { %v900_v33 = vpack.c.bf16 %v3145_v29, %v3147_v31 }
 0x218   : > { %v1691_v57 = vpop.f32.mrf.mxu1 }
 0x219   : > { %v1692_v0 = vadd.f32 %v3876_v42, %v1691_v57 }
 0x21c   : > { %v875_v32 = vpop.f32.mrf.mxu3 }
 0x21d   : > { %v876_v35 = vadd.f32 %v3799_v60, %v875_v32  ;;  %v2894_v60 = vld [vmem:[%s4210_s4 + $0xc0] sm:$0xff] }
 0x21e   : > { %1122 = vmatpush.bf16.msrb.mxu3 %v2894_v60 }
 0x21f   : > { %3148 = vtanh.f32 %v876_v35 }
 0x220   : > { %3150 = vtanh.f32 %v874_v36  ;;  %v1694_v2 = vpop.f32.mrf.mxu1 }
 0x221   : > { %3152 = vtanh.f32 %v1682_v44  ;;  %v1695_v18 = vadd.f32 %v3876_v42, %v1694_v2 }
 0x222   : > { %3154 = vtanh.f32 %v1680_v45  ;;  %1952 = vmatpush.bf16.msra.mxu3 %v2933_v56 }
 0x223   : > { %3156 = vtanh.f32 %v1687_v49  ;;  %v2928_v49 = vld [vmem:[%s4210_s4 + $0x90] sm:$0xff] }
 0x224   : > { %1010 = vmatmul.bf16.gmra.mxu2 %v900_v33  ;;  %3158 = vtanh.f32 %v1685_v50 }
 0x225   : > { %v3149_v39 = vpop.eup %3148 }
 0x226   : > { %v3151_v40 = vpop.eup %3150  ;;  %1953 = vmatpush.bf16.msra.mxu3 %v2932_v53 }
 0x227   : > { %v901_v41 = vpack.c.bf16 %v3149_v39, %v3151_v40  ;;  %v3153_v46 = vpop.eup %3152 }
 0x228   : > { %v3155_v47 = vpop.eup %3154  ;;  %v1696_v62 = vpop.f32.mrf.mxu1 }
 0x229   : > { %v1735_v48 = vpack.c.bf16 %v3153_v46, %v3155_v47  ;;  %v3157_v55 = vpop.eup %3156  ;;  %v1697_v15 = vadd.f32 %v3876_v42, %v1696_v62 }
 0x22a   : > { %v3159_v61 = vpop.eup %3158  ;;  %1954 = vmatpush.bf16.msra.mxu3 %v2931_v7 }
 0x22b   : > { %v1736_v63 = vpack.c.bf16 %v3157_v55, %v3159_v61 }
 0x22e   : > { %1955 = vmatpush.bf16.msra.mxu3 %v2930_v22  ;;  %v2926_v22 = vld [vmem:[%s4210_s4 + $0x80] sm:$0xff] }
 0x230   : > { %v1699_v8 = vpop.f32.mrf.mxu1 }
 0x231   : > { %v1700_v32 = vadd.f32 %v3876_v42, %v1699_v8 }
 0x232   : > { %1956 = vmatpush.bf16.msra.mxu3 %v2929_v37  ;;  %v2903_v37 = vld [vmem:[%s4212_s6 + $0x8] sm:$0xff] }
 0x234   : > { %1015 = vmatmul.bf16.gmra.mxu2 %v901_v41 }
 0x236   : > { %1957 = vmatpush.bf16.msra.mxu3 %v2928_v49 }
 0x238   : > { %v1701_v16 = vpop.f32.mrf.mxu1 }
 0x239   : > { %v1702_v30 = vadd.f32 %v3876_v42, %v1701_v16 }
 0x240   : > { %v1704_v26 = vpop.f32.mrf.mxu1 }
 0x241   : > { %v1705_v57 = vadd.f32 %v3876_v42, %v1704_v26 }
 0x244   : > { %1819 = vmatmul.bf16.vlgmr.msra.gmra.mxu2 %v1735_v48 }
 0x247   : > { %v981_v51 = vpop.f32.mrf.mxu2 }
 0x248   : > { %v982_v54 = vadd.f32 %v3891_v52, %v981_v51  ;;  %v1706_v36 = vpop.f32.mrf.mxu1 }
 0x249   : > { %v1707_v45 = vadd.f32 %v3876_v42, %v1706_v36 }
 0x24a   : > { %3160 = vtanh.f32 %v982_v54 }
 0x24f   : > { %v983_v58 = vpop.f32.mrf.mxu2 }
 0x250   : > { %v984_v59 = vadd.f32 %v3891_v52, %v983_v58  ;;  %v3161_v1 = vpop.eup %3160  ;;  %v1709_v44 = vpop.f32.mrf.mxu1 }
 0x252   : > { %3162 = vtanh.f32 %v984_v59  ;;  %v2909_v59 = vld [vmem:[%s4212_s6 + $0x38] sm:$0xff] }
 0x253   : > { %3164 = vtanh.f32 %v1692_v0  ;;  %1255 = vmatpush.bf16.msrb.mxu0 %v2909_v59 }
 0x254   : > { %1824 = vmatmul.bf16.gmra.mxu2 %v1736_v63  ;;  %3166 = vtanh.f32 %v1690_v3  ;;  %v1710_v63 = vadd.f32 %v3876_v42, %v1709_v44 }
 0x257   : > { %v986_v4 = vpop.f32.mrf.mxu2 }
 0x258   : > { %v3163_v5 = vpop.eup %3162  ;;  %v987_v9 = vadd.f32 %v3891_v52, %v986_v4  ;;  %v1711_v51 = vpop.f32.mrf.mxu1 }
 0x259   : > { %v1037_v6 = vpack.c.bf16 %v3163_v5, %v3161_v1  ;;  %v3165_v10 = vpop.eup %3164  ;;  %v1712_v61 = vadd.f32 %v3876_v42, %v1711_v51  ;;  %v2908_v5 = vld [vmem:[%s4212_s6 + $0x30] sm:$0xff] }
 0x25a   : > { %v3167_v13 = vpop.eup %3166  ;;  %3168 = vtanh.f32 %v987_v9  ;;  %1256 = vmatpush.bf16.msrb.mxu0 %v2908_v5 }
 0x25b   : > { %1123 = vmatmul.bf16.vlgmr.msrb.gmra.mxu3 %v1037_v6  ;;  %v1737_v14 = vpack.c.bf16 %v3165_v10, %v3167_v13  ;;  %v2927_v6 = vld [vmem:[%s4210_s4 + $0x88] sm:$0xff] }
 0x25c   : > { %1958 = vmatpush.bf16.msra.mxu3 %v2927_v6 }
 0x25f   : > { %v988_v11 = vpop.f32.mrf.mxu2 }
 0x260   : > { %v989_v12 = vadd.f32 %v3891_v52, %v988_v11  ;;  %v3169_v17 = vpop.eup %3168  ;;  %v1714_v3 = vpop.f32.mrf.mxu1  ;;  %1959 = vmatpush.bf16.msra.mxu3 %v2926_v22 }
 0x262   : > { %3170 = vtanh.f32 %v989_v12 }
 0x263   : > { %3172 = vtanh.f32 %v1697_v15 }
 0x264   : > { %1829 = vmatmul.bf16.gmra.mxu2 %v1737_v14  ;;  %3174 = vtanh.f32 %v1695_v18  ;;  %v2907_v14 = vld [vmem:[%s4212_s6 + $0x28] sm:$0xff] }
 0x265   : > { %1257 = vmatpush.bf16.msrb.mxu0 %v2907_v14 }
 0x267   : > { %v991_v20 = vpop.f32.mrf.mxu2 }
 0x268   : > { %v3171_v21 = vpop.eup %3170  ;;  %v992_v23 = vadd.f32 %v3891_v52, %v991_v20  ;;  %v1716_v12 = vpop.f32.mrf.mxu1 }
 0x269   : > { %v1038_v19 = vpack.c.bf16 %v3171_v21, %v3169_v17  ;;  %v3173_v24 = vpop.eup %3172  ;;  %v1717_v15 = vadd.f32 %v3876_v42, %v1716_v12  ;;  %v1715_v17 = vadd.f32 %v3876_v42, %v1714_v3 }
 0x26a   : > { %v3175_v28 = vpop.eup %3174  ;;  %3176 = vtanh.f32 %v992_v23 }
 0x26b   : > { %1128 = vmatmul.bf16.gmra.mxu3 %v1038_v19  ;;  %v1738_v29 = vpack.c.bf16 %v3173_v24, %v3175_v28  ;;  %v2906_v19 = vld [vmem:[%s4212_s6 + $0x20] sm:$0xff] }
 0x26c   : > { %1258 = vmatpush.bf16.msrb.mxu0 %v2906_v19 }
 0x26f   : > { %v993_v25 = vpop.f32.mrf.mxu2 }
 0x270   : > { %v994_v27 = vadd.f32 %v3891_v52, %v993_v25  ;;  %v3177_v31 = vpop.eup %3176 }
 0x272   : > { %3178 = vtanh.f32 %v994_v27 }
 0x273   : > { %3180 = vtanh.f32 %v1702_v30 }
 0x274   : > { %1834 = vmatmul.bf16.gmra.mxu2 %v1738_v29  ;;  %3182 = vtanh.f32 %v1700_v32  ;;  %v2905_v32 = vld [vmem:[%s4212_s6 + $0x18] sm:$0xff] }
 0x275   : > { %1259 = vmatpush.bf16.msrb.mxu0 %v2905_v32 }
 0x277   : > { %v996_v33 = vpop.f32.mrf.mxu2 }
 0x278   : > { %v3179_v34 = vpop.eup %3178  ;;  %v997_v38 = vadd.f32 %v3891_v52, %v996_v33  ;;  %v2904_v33 = vld [vmem:[%s4212_s6 + $0x10] sm:$0xff] }
 0x279   : > { %v1039_v35 = vpack.c.bf16 %v3179_v34, %v3177_v31  ;;  %v3181_v39 = vpop.eup %3180  ;;  %1260 = vmatpush.bf16.msrb.mxu0 %v2904_v33 }
 0x27a   : > { %v3183_v60 = vpop.eup %3182  ;;  %3184 = vtanh.f32 %v997_v38 }
 0x27b   : > { %1133 = vmatmul.bf16.gmra.mxu3 %v1039_v35  ;;  %v1739_v43 = vpack.c.bf16 %v3181_v39, %v3183_v60 }
 0x27d   : > { %1261 = vmatpush.bf16.msrb.mxu0 %v2903_v37 }
 0x27f   : > { %v998_v40 = vpop.f32.mrf.mxu2 }
 0x280   : > { %v999_v41 = vadd.f32 %v3891_v52, %v998_v40  ;;  %v3185_v56 = vpop.eup %3184 }
 0x282   : > { %3186 = vtanh.f32 %v999_v41  ;;  %v3966_v41 = vld [vmem:[%s4211_s5 + $0x1] ss:$0 sm:$0xff] }
 0x283   : > { %3188 = vtanh.f32 %v1707_v45 }
 0x284   : > { %1839 = vmatmul.bf16.gmra.mxu2 %v1739_v43  ;;  %3190 = vtanh.f32 %v1705_v57 }
 0x287   : > { %v1001_v46 = vpop.f32.mrf.mxu2 }
 0x288   : > { %v3187_v47 = vpop.eup %3186  ;;  %v1002_v50 = vadd.f32 %v3891_v52, %v1001_v46 }
 0x289   : > { %v1040_v48 = vpack.c.bf16 %v3187_v47, %v3185_v56  ;;  %v3189_v2 = vpop.eup %3188  ;;  %v2941_v56 = vld [vmem:[%s4210_s4 + $0xf8] sm:$0xff] }
 0x28a   : > { %v3191_v55 = vpop.eup %3190  ;;  %3192 = vtanh.f32 %v1002_v50 }
 0x28b   : > { %1138 = vmatmul.bf16.gmra.mxu3 %v1040_v48  ;;  %v1740_v58 = vpack.c.bf16 %v3189_v2, %v3191_v55  ;;  %v3980_v2 = vld [vmem:[%s4211_s5 + $0x3] ss:$0 sm:$0xff] }
 0x28f   : > { %v1003_v53 = vpop.f32.mrf.mxu2 }
 0x290   : > { %v1004_v54 = vadd.f32 %v3891_v52, %v1003_v53  ;;  %v3193_v62 = vpop.eup %3192 }
 0x292   : > { %3194 = vtanh.f32 %v1004_v54  ;;  %v2940_v54 = vld [vmem:[%s4210_s4 + $0xf0] sm:$0xff] }
 0x293   : > { %3196 = vtanh.f32 %v1712_v61 }
 0x294   : > { %1844 = vmatmul.bf16.gmra.mxu2 %v1740_v58  ;;  %3198 = vtanh.f32 %v1710_v63 }
 0x297   : > { %v1006_v0 = vpop.f32.mrf.mxu2 }
 0x298   : > { %v3195_v1 = vpop.eup %3194  ;;  %v1007_v7 = vadd.f32 %v3891_v52, %v1006_v0 }
 0x299   : > { %v1041_v4 = vpack.c.bf16 %v3195_v1, %v3193_v62  ;;  %v3197_v8 = vpop.eup %3196 }
 0x29a   : > { %v3199_v11 = vpop.eup %3198  ;;  %3200 = vtanh.f32 %v1007_v7 }
 0x29b   : > { %1143 = vmatmul.bf16.gmra.mxu3 %v1041_v4  ;;  %v1741_v13 = vpack.c.bf16 %v3197_v8, %v3199_v11 }
 0x29f   : > { %v1008_v9 = vpop.f32.mrf.mxu2 }
 0x2a0   : > { %v1009_v10 = vadd.f32 %v3891_v52, %v1008_v9  ;;  %v3201_v16 = vpop.eup %3200  ;;  %v2939_v9 = vld [vmem:[%s4210_s4 + $0xe8] sm:$0xff] }
 0x2a2   : > { %3202 = vtanh.f32 %v1009_v10 }
 0x2a3   : > { %3204 = vtanh.f32 %v1717_v15 }
 0x2a4   : > { %1849 = vmatmul.bf16.gmra.mxu2 %v1741_v13  ;;  %3206 = vtanh.f32 %v1715_v17 }
 0x2a7   : > { %v1011_v18 = vpop.f32.mrf.mxu2 }
 0x2a8   : > { %v3203_v20 = vpop.eup %3202  ;;  %v1012_v23 = vadd.f32 %v3891_v52, %v1011_v18 }
 0x2a9   : > { %v1042_v21 = vpack.c.bf16 %v3203_v20, %v3201_v16  ;;  %v3205_v24 = vpop.eup %3204 }
 0x2aa   : > { %v3207_v26 = vpop.eup %3206  ;;  %3208 = vtanh.f32 %v1012_v23 }
 0x2ab   : > { %1148 = vmatmul.bf16.gmra.mxu3 %v1042_v21  ;;  %v1742_v27 = vpack.c.bf16 %v3205_v24, %v3207_v26  ;;  %v2938_v24 = vld [vmem:[%s4210_s4 + $0xe0] sm:$0xff] }
 0x2af   : > { %v1013_v42 = vpop.f32.mrf.mxu2 }
 0x2b0   : > { %v1014_v25 = vadd.f32 %v3891_v52, %v1013_v42  ;;  %v3209_v28 = vpop.eup %3208 }
 0x2b2   : > { %3210 = vtanh.f32 %v1014_v25 }
 0x2b4   : > { %1854 = vmatmul.bf16.gmra.mxu2 %v1742_v27 }
 0x2b7   : > { %v1016_v29 = vpop.f32.mrf.mxu2 }
 0x2b8   : > { %v3211_v30 = vpop.eup %3210  ;;  %v1017_v34 = vadd.f32 %v3891_v52, %v1016_v29 }
 0x2b9   : > { %v1043_v31 = vpack.c.bf16 %v3211_v30, %v3209_v28 }
 0x2ba   : > { %3212 = vtanh.f32 %v1017_v34 }
 0x2bb   : > { %1153 = vmatmul.bf16.gmra.mxu3 %v1043_v31 }
 0x2bf   : > { %v1018_v35 = vpop.f32.mrf.mxu2 }
 0x2c0   : > { %v1019_v36 = vadd.f32 %v3891_v52, %v1018_v35  ;;  %v3213_v38 = vpop.eup %3212  ;;  %v2902_v52 = vld [vmem:[%s4212_s6] sm:$0xff] }
 0x2c1   : > { %1262 = vmatpush.bf16.msrb.mxu0 %v2902_v52 }
 0x2c2   : > { %3214 = vtanh.f32 %v1019_v36 }
 0x2c5   : > { %2093 = vmatpush.bf16.msra.mxu0 %v2941_v56 }
 0x2c7   : > { %v1820_v39 = vpop.f32.mrf.mxu2 }
 0x2c8   : > { %v3215_v40 = vpop.eup %3214  ;;  %v1821_v43 = vadd.f32 %v3966_v41, %v1820_v39 }
 0x2c9   : > { %v1044_v60 = vpack.c.bf16 %v3215_v40, %v3213_v38  ;;  %2094 = vmatpush.bf16.msra.mxu0 %v2940_v54  ;;  %v2937_v38 = vld [vmem:[%s4210_s4 + $0xd8] sm:$0xff] }
 0x2ca   : > { %3216 = vtanh.f32 %v1821_v43 }
 0x2cb   : > { %1158 = vmatmul.bf16.gmra.mxu3 %v1044_v60 }
 0x2cd   : > { %2095 = vmatpush.bf16.msra.mxu0 %v2939_v9 }
 0x2cf   : > { %v1822_v44 = vpop.f32.mrf.mxu2 }
 0x2d0   : > { %v1823_v45 = vadd.f32 %v3966_v41, %v1822_v44  ;;  %v3217_v57 = vpop.eup %3216 }
 0x2d1   : > { %2096 = vmatpush.bf16.msra.mxu0 %v2938_v24 }
 0x2d2   : > { %3218 = vtanh.f32 %v1823_v45 }
 0x2d5   : > { %2097 = vmatpush.bf16.msra.mxu0 %v2937_v38 }
 0x2d7   : > { %v1825_v46 = vpop.f32.mrf.mxu2 }
 0x2d8   : > { %v3219_v47 = vpop.eup %3218  ;;  %v1826_v49 = vadd.f32 %v3966_v41, %v1825_v46 }
 0x2d9   : > { %v1876_v48 = vpack.c.bf16 %v3219_v47, %v3217_v57 }
 0x2da   : > { %3220 = vtanh.f32 %v1826_v49 }
 0x2db   : > { %1960 = vmatmul.bf16.vlgmr.msra.gmra.mxu3 %v1876_v48 }
 0x2de   : > { %v1124_v50 = vpop.f32.mrf.mxu3 }
 0x2df   : > { %v1827_v51 = vpop.f32.mrf.mxu2  ;;  %v1125_v55 = vadd.f32 %v3980_v2, %v1124_v50 }
 0x2e0   : > { %v1828_v53 = vadd.f32 %v3966_v41, %v1827_v51  ;;  %v3221_v59 = vpop.eup %3220  ;;  %v2936_v51 = vld [vmem:[%s4210_s4 + $0xd0] sm:$0xff] }
 0x2e1   : > { %2098 = vmatpush.bf16.msra.mxu0 %v2936_v51 }
 0x2e2   : > { %3222 = vtanh.f32 %v1828_v53 }
 0x2e3   : > { %3224 = vtanh.f32 %v1125_v55 }
 0x2e6   : > { %v1126_v58 = vpop.f32.mrf.mxu3 }
 0x2e7   : > { %v1127_v61 = vadd.f32 %v3980_v2, %v1126_v58  ;;  %v1830_v62 = vpop.f32.mrf.mxu2 }
 0x2e8   : > { %v3223_v63 = vpop.eup %3222  ;;  %v1831_v1 = vadd.f32 %v3966_v41, %v1830_v62 }
 0x2e9   : > { %3226 = vtanh.f32 %v1127_v61  ;;  %v1877_v0 = vpack.c.bf16 %v3223_v63, %v3221_v59  ;;  %v3225_v3 = vpop.eup %3224 }
 0x2ea   : > { %3228 = vtanh.f32 %v1831_v1 }
 0x2eb   : > { %1965 = vmatmul.bf16.gmra.mxu3 %v1877_v0 }
 0x2ee   : > { %v1129_v4 = vpop.f32.mrf.mxu3 }
 0x2ef   : > { %v3227_v5 = vpop.eup %3226  ;;  %v1832_v6 = vpop.f32.mrf.mxu2  ;;  %v1130_v10 = vadd.f32 %v3980_v2, %v1129_v4 }
 0x2f0   : > { %v1833_v7 = vadd.f32 %v3966_v41, %v1832_v6  ;;  %v1180_v8 = vpack.c.bf16 %v3227_v5, %v3225_v3  ;;  %v3229_v12 = vpop.eup %3228 }
 0x2f2   : > { %3230 = vtanh.f32 %v1833_v7  ;;  %1263 = vmatmul.bf16.vlgmr.msrb.gmra.mxu0 %v1180_v8  ;;  %v2935_v7 = vld [vmem:[%s4210_s4 + $0xc8] sm:$0xff] }
 0x2f3   : > { %3232 = vtanh.f32 %v1130_v10  ;;  %2099 = vmatpush.bf16.msra.mxu0 %v2935_v7 }
 0x2f6   : > { %v1131_v11 = vpop.f32.mrf.mxu3 }
 0x2f7   : > { %v1132_v13 = vadd.f32 %v3980_v2, %v1131_v11  ;;  %v1835_v14 = vpop.f32.mrf.mxu2 }
 0x2f8   : > { %v3231_v15 = vpop.eup %3230  ;;  %v1836_v17 = vadd.f32 %v3966_v41, %v1835_v14 }
 0x2f9   : > { %3234 = vtanh.f32 %v1132_v13  ;;  %v1878_v16 = vpack.c.bf16 %v3231_v15, %v3229_v12  ;;  %v3233_v18 = vpop.eup %3232 }
 0x2fa   : > { %3236 = vtanh.f32 %v1836_v17 }
 0x2fb   : > { %1970 = vmatmul.bf16.gmra.mxu3 %v1878_v16 }
 0x2fe   : > { %v1134_v20 = vpop.f32.mrf.mxu3 }
 0x2ff   : > { %v3235_v21 = vpop.eup %3234  ;;  %v1837_v19 = vpop.f32.mrf.mxu2  ;;  %v1135_v42 = vadd.f32 %v3980_v2, %v1134_v20 }
 0x300   : > { %v1838_v22 = vadd.f32 %v3966_v41, %v1837_v19  ;;  %v1181_v23 = vpack.c.bf16 %v3235_v21, %v3233_v18  ;;  %v3237_v26 = vpop.eup %3236 }
 0x302   : > { %3238 = vtanh.f32 %v1838_v22  ;;  %1268 = vmatmul.bf16.gmra.mxu0 %v1181_v23  ;;  %v2934_v22 = vld [vmem:[%s4210_s4 + $0xc0] sm:$0xff] }
 0x303   : > { %3240 = vtanh.f32 %v1135_v42  ;;  %2100 = vmatpush.bf16.msra.mxu0 %v2934_v22 }
 0x306   : > { %v1136_v25 = vpop.f32.mrf.mxu3 }
 0x307   : > { %v1137_v27 = vadd.f32 %v3980_v2, %v1136_v25  ;;  %v1840_v28 = vpop.f32.mrf.mxu2 }
 0x308   : > { %v3239_v29 = vpop.eup %3238  ;;  %v1841_v31 = vadd.f32 %v3966_v41, %v1840_v28 }
 0x309   : > { %3242 = vtanh.f32 %v1137_v27  ;;  %v1879_v30 = vpack.c.bf16 %v3239_v29, %v3237_v26  ;;  %v3241_v32 = vpop.eup %3240 }
 0x30a   : > { %3244 = vtanh.f32 %v1841_v31 }
 0x30b   : > { %1975 = vmatmul.bf16.gmra.mxu3 %v1879_v30 }
 0x30e   : > { %v1139_v33 = vpop.f32.mrf.mxu3 }
 0x30f   : > { %v3243_v34 = vpop.eup %3242  ;;  %v1842_v35 = vpop.f32.mrf.mxu2  ;;  %v1140_v39 = vadd.f32 %v3980_v2, %v1139_v33 }
 0x310   : > { %v1843_v36 = vadd.f32 %v3966_v41, %v1842_v35  ;;  %v1182_v37 = vpack.c.bf16 %v3243_v34, %v3241_v32  ;;  %v3245_v60 = vpop.eup %3244 }
 0x312   : > { %3246 = vtanh.f32 %v1843_v36  ;;  %1273 = vmatmul.bf16.gmra.mxu0 %v1182_v37  ;;  %v4035_v37 = vld [vmem:[%s4211_s5 + $0x2] ss:$0 sm:$0xff] }
 0x313   : > { %3248 = vtanh.f32 %v1140_v39  ;;  %v2949_v39 = vld [vmem:[%s4212_s6 + $0x38] sm:$0xff] }
 0x314   : > { %2230 = vmatpush.bf16.msra.mxu1 %v2949_v39 }
 0x316   : > { %v1141_v40 = vpop.f32.mrf.mxu3 }
 0x317   : > { %v1142_v52 = vadd.f32 %v3980_v2, %v1141_v40  ;;  %v1845_v43 = vpop.f32.mrf.mxu2 }
 0x318   : > { %v3247_v44 = vpop.eup %3246  ;;  %v1846_v56 = vadd.f32 %v3966_v41, %v1845_v43 }
 0x319   : > { %3250 = vtanh.f32 %v1142_v52  ;;  %v1880_v45 = vpack.c.bf16 %v3247_v44, %v3245_v60  ;;  %v3249_v57 = vpop.eup %3248  ;;  %v4048_v52 = vld [vmem:[%s4213_s7] ss:$0 sm:$0xff] }
 0x31a   : > { %3252 = vtanh.f32 %v1846_v56 }
 0x31b   : > { %1980 = vmatmul.bf16.gmra.mxu3 %v1880_v45 }
 0x31e   : > { %v1144_v46 = vpop.f32.mrf.mxu3 }
 0x31f   : > { %v3251_v47 = vpop.eup %3250  ;;  %v1847_v48 = vpop.f32.mrf.mxu2  ;;  %v1145_v53 = vadd.f32 %v3980_v2, %v1144_v46 }
 0x320   : > { %v1848_v49 = vadd.f32 %v3966_v41, %v1847_v48  ;;  %v1183_v50 = vpack.c.bf16 %v3251_v47, %v3249_v57  ;;  %v3253_v55 = vpop.eup %3252  ;;  %v2948_v47 = vld [vmem:[%s4212_s6 + $0x30] sm:$0xff] }
 0x321   : > { %2231 = vmatpush.bf16.msra.mxu1 %v2948_v47 }
 0x322   : > { %3254 = vtanh.f32 %v1848_v49  ;;  %1278 = vmatmul.bf16.gmra.mxu0 %v1183_v50 }
 0x323   : > { %3256 = vtanh.f32 %v1145_v53 }
 0x326   : > { %v1146_v54 = vpop.f32.mrf.mxu3 }
 0x327   : > { %v1147_v58 = vadd.f32 %v3980_v2, %v1146_v54  ;;  %v1850_v59 = vpop.f32.mrf.mxu2 }
 0x328   : > { %v3255_v61 = vpop.eup %3254  ;;  %v1851_v63 = vadd.f32 %v3966_v41, %v1850_v59 }
 0x329   : > { %3258 = vtanh.f32 %v1147_v58  ;;  %v1881_v62 = vpack.c.bf16 %v3255_v61, %v3253_v55  ;;  %v3257_v0 = vpop.eup %3256 }
 0x32a   : > { %3260 = vtanh.f32 %v1851_v63  ;;  %v2947_v63 = vld [vmem:[%s4212_s6 + $0x28] sm:$0xff] }
 0x32b   : > { %1985 = vmatmul.bf16.gmra.mxu3 %v1881_v62  ;;  %2232 = vmatpush.bf16.msra.mxu1 %v2947_v63 }
 0x32e   : > { %v1149_v1 = vpop.f32.mrf.mxu3 }
 0x32f   : > { %v3259_v3 = vpop.eup %3258  ;;  %v1852_v4 = vpop.f32.mrf.mxu2  ;;  %v1150_v8 = vadd.f32 %v3980_v2, %v1149_v1 }
 0x330   : > { %v1853_v5 = vadd.f32 %v3966_v41, %v1852_v4  ;;  %v1184_v6 = vpack.c.bf16 %v3259_v3, %v3257_v0  ;;  %v3261_v10 = vpop.eup %3260 }
 0x332   : > { %3262 = vtanh.f32 %v1853_v5  ;;  %1283 = vmatmul.bf16.gmra.mxu0 %v1184_v6 }
 0x333   : > { %3264 = vtanh.f32 %v1150_v8 }
 0x336   : > { %v1151_v9 = vpop.f32.mrf.mxu3 }
 0x337   : > { %v1152_v11 = vadd.f32 %v3980_v2, %v1151_v9  ;;  %v1855_v12 = vpop.f32.mrf.mxu2 }
 0x338   : > { %v3263_v13 = vpop.eup %3262  ;;  %v1856_v15 = vadd.f32 %v3966_v41, %v1855_v12  ;;  %v2946_v12 = vld [vmem:[%s4212_s6 + $0x20] sm:$0xff] }
 0x339   : > { %3266 = vtanh.f32 %v1152_v11  ;;  %v1882_v14 = vpack.c.bf16 %v3263_v13, %v3261_v10  ;;  %v3265_v16 = vpop.eup %3264  ;;  %2233 = vmatpush.bf16.msra.mxu1 %v2946_v12 }
 0x33a   : > { %3268 = vtanh.f32 %v1856_v15 }
 0x33b   : > { %1990 = vmatmul.bf16.gmra.mxu3 %v1882_v14 }
 0x33e   : > { %v1154_v17 = vpop.f32.mrf.mxu3 }
 0x33f   : > { %v3267_v18 = vpop.eup %3266  ;;  %v1857_v20 = vpop.f32.mrf.mxu2  ;;  %v1155_v23 = vadd.f32 %v3980_v2, %v1154_v17 }
 0x340   : > { %v1858_v21 = vadd.f32 %v3966_v41, %v1857_v20  ;;  %v1185_v19 = vpack.c.bf16 %v3267_v18, %v3265_v16  ;;  %v3269_v42 = vpop.eup %3268 }
 0x342   : > { %3270 = vtanh.f32 %v1858_v21  ;;  %1288 = vmatmul.bf16.gmra.mxu0 %v1185_v19 }
 0x343   : > { %3272 = vtanh.f32 %v1155_v23 }
 0x346   : > { %v1156_v24 = vpop.f32.mrf.mxu3 }
 0x347   : > { %v1157_v25 = vadd.f32 %v3980_v2, %v1156_v24  ;;  %v2945_v24 = vld [vmem:[%s4212_s6 + $0x18] sm:$0xff] }
 0x348   : > { %v3271_v26 = vpop.eup %3270  ;;  %2234 = vmatpush.bf16.msra.mxu1 %v2945_v24 }
 0x349   : > { %3274 = vtanh.f32 %v1157_v25  ;;  %v1883_v27 = vpack.c.bf16 %v3271_v26, %v3269_v42  ;;  %v3273_v41 = vpop.eup %3272 }
 0x34b   : > { %1995 = vmatmul.bf16.gmra.mxu3 %v1883_v27 }
 0x34e   : > { %v1159_v28 = vpop.f32.mrf.mxu3 }
 0x34f   : > { %v3275_v29 = vpop.eup %3274  ;;  %v1160_v31 = vadd.f32 %v3980_v2, %v1159_v28 }
 0x350   : > { %v1186_v30 = vpack.c.bf16 %v3275_v29, %v3273_v41 }
 0x351   : > { %3276 = vtanh.f32 %v1160_v31 }
 0x352   : > { %1293 = vmatmul.bf16.gmra.mxu0 %v1186_v30 }
 0x356   : > { %v1161_v32 = vpop.f32.mrf.mxu3 }
 0x357   : > { %v1162_v33 = vadd.f32 %v3980_v2, %v1161_v32  ;;  %v3277_v34 = vpop.eup %3276 }
 0x359   : > { %3278 = vtanh.f32 %v1162_v33 }
 0x35e   : > { %v1961_v35 = vpop.f32.mrf.mxu3 }
 0x35f   : > { %v3279_v36 = vpop.eup %3278  ;;  %v1962_v2 = vadd.f32 %v4035_v37, %v1961_v35 }
 0x360   : > { %v1187_v38 = vpack.c.bf16 %v3279_v36, %v3277_v34  ;;  %v2944_v34 = vld [vmem:[%s4212_s6 + $0x10] sm:$0xff] }
 0x361   : > { %3280 = vtanh.f32 %v1962_v2  ;;  %2235 = vmatpush.bf16.msra.mxu1 %v2944_v34 }
 0x362   : > { %1298 = vmatmul.bf16.gmra.mxu0 %v1187_v38 }
 0x366   : > { %v1963_v40 = vpop.f32.mrf.mxu3 }
 0x367   : > { %v1964_v60 = vadd.f32 %v4035_v37, %v1963_v40  ;;  %v3281_v43 = vpop.eup %3280 }
 0x369   : > { %3282 = vtanh.f32 %v1964_v60 }
 0x36e   : > { %v1966_v44 = vpop.f32.mrf.mxu3 }
 0x36f   : > { %v3283_v45 = vpop.eup %3282  ;;  %v1264_v56 = vpop.f32.mrf.mxu0  ;;  %v1967_v48 = vadd.f32 %v4035_v37, %v1966_v44 }
 0x370   : > { %v2017_v57 = vpack.c.bf16 %v3283_v45, %v3281_v43  ;;  %v1265_v46 = vadd.f32 %v4048_v52, %v1264_v56 }
 0x371   : > { %3284 = vtanh.f32 %v1967_v48 }
 0x372   : > { %1304 = vst [vmem:[%s4051_s12] sm:$0xff] %v1265_v46  ;;  %2101 = vmatmul.bf16.vlgmr.msra.gmra.mxu0 %v2017_v57  ;;  %v2943_v57 = vld [vmem:[%s4212_s6 + $0x8] sm:$0xff] }
 0x373   : > { %2236 = vmatpush.bf16.msra.mxu1 %v2943_v57 }
 0x376   : > { %v1968_v49 = vpop.f32.mrf.mxu3 }
 0x377   : > { %v1969_v50 = vadd.f32 %v4035_v37, %v1968_v49  ;;  %v1266_v51 = vpop.f32.mrf.mxu0  ;;  %v3285_v54 = vpop.eup %3284 }
 0x378   : > { %v1267_v53 = vadd.f32 %v4048_v52, %v1266_v51 }
 0x379   : > { %3286 = vtanh.f32 %v1969_v50 }
 0x37a   : > { %1305 = vst [vmem:[%s4051_s12 + $0x8] sm:$0xff] %v1267_v53 }
 0x37e   : > { %v1971_v55 = vpop.f32.mrf.mxu3 }
 0x37f   : > { %v3287_v58 = vpop.eup %3286  ;;  %v1269_v59 = vpop.f32.mrf.mxu0  ;;  %v1972_v0 = vadd.f32 %v4035_v37, %v1971_v55 }
 0x380   : > { %v1270_v61 = vadd.f32 %v4048_v52, %v1269_v59  ;;  %v2018_v62 = vpack.c.bf16 %v3287_v58, %v3285_v54 }
 0x381   : > { %3288 = vtanh.f32 %v1972_v0 }
 0x382   : > { %1306 = vst [vmem:[%s4051_s12 + $0x10] sm:$0xff] %v1270_v61  ;;  %2106 = vmatmul.bf16.gmra.mxu0 %v2018_v62  ;;  %v2942_v61 = vld [vmem:[%s4212_s6] sm:$0xff] }
 0x383   : > { %2237 = vmatpush.bf16.msra.mxu1 %v2942_v61 }
 0x386   : > { %v1973_v1 = vpop.f32.mrf.mxu3 }
 0x387   : > { %v1974_v3 = vadd.f32 %v4035_v37, %v1973_v1  ;;  %v1271_v4 = vpop.f32.mrf.mxu0  ;;  %v3289_v6 = vpop.eup %3288 }
 0x388   : > { %v1272_v5 = vadd.f32 %v4048_v52, %v1271_v4 }
 0x389   : > { %3290 = vtanh.f32 %v1974_v3 }
 0x38a   : > { %1307 = vst [vmem:[%s4051_s12 + $0x18] sm:$0xff] %v1272_v5 }
 0x38e   : > { %v1976_v7 = vpop.f32.mrf.mxu3 }
 0x38f   : > { %v3291_v8 = vpop.eup %3290  ;;  %v1274_v9 = vpop.f32.mrf.mxu0  ;;  %v1977_v13 = vadd.f32 %v4035_v37, %v1976_v7 }
 0x390   : > { %v1275_v10 = vadd.f32 %v4048_v52, %v1274_v9  ;;  %v2019_v11 = vpack.c.bf16 %v3291_v8, %v3289_v6 }
 0x391   : > { %3292 = vtanh.f32 %v1977_v13 }
 0x392   : > { %1308 = vst [vmem:[%s4051_s12 + $0x20] sm:$0xff] %v1275_v10  ;;  %2111 = vmatmul.bf16.gmra.mxu0 %v2019_v11 }
 0x396   : > { %v1978_v14 = vpop.f32.mrf.mxu3 }
 0x397   : > { %v1979_v15 = vadd.f32 %v4035_v37, %v1978_v14  ;;  %v1276_v16 = vpop.f32.mrf.mxu0  ;;  %v3293_v18 = vpop.eup %3292 }
 0x398   : > { %v1277_v17 = vadd.f32 %v4048_v52, %v1276_v16 }
 0x399   : > { %3294 = vtanh.f32 %v1979_v15 }
 0x39a   : > { %1309 = vst [vmem:[%s4051_s12 + $0x28] sm:$0xff] %v1277_v17 }
 0x39e   : > { %v1981_v20 = vpop.f32.mrf.mxu3 }
 0x39f   : > { %v3295_v21 = vpop.eup %3294  ;;  %v1279_v19 = vpop.f32.mrf.mxu0  ;;  %v1982_v42 = vadd.f32 %v4035_v37, %v1981_v20 }
 0x3a0   : > { %v1280_v22 = vadd.f32 %v4048_v52, %v1279_v19  ;;  %v2020_v23 = vpack.c.bf16 %v3295_v21, %v3293_v18 }
 0x3a1   : > { %3296 = vtanh.f32 %v1982_v42 }
 0x3a2   : > { %1310 = vst [vmem:[%s4051_s12 + $0x30] sm:$0xff] %v1280_v22  ;;  %2116 = vmatmul.bf16.gmra.mxu0 %v2020_v23 }
 0x3a6   : > { %v1983_v25 = vpop.f32.mrf.mxu3 }
 0x3a7   : > { %v1984_v26 = vadd.f32 %v4035_v37, %v1983_v25  ;;  %v1281_v27 = vpop.f32.mrf.mxu0  ;;  %v3297_v28 = vpop.eup %3296 }
 0x3a8   : > { %v1282_v41 = vadd.f32 %v4048_v52, %v1281_v27 }
 0x3a9   : > { %3298 = vtanh.f32 %v1984_v26 }
 0x3aa   : > { %1311 = vst [vmem:[%s4051_s12 + $0x38] sm:$0xff] %v1282_v41 }
 0x3ae   : > { %v1986_v29 = vpop.f32.mrf.mxu3 }
 0x3af   : > { %v3299_v30 = vpop.eup %3298  ;;  %v1284_v31 = vpop.f32.mrf.mxu0  ;;  %v1987_v35 = vadd.f32 %v4035_v37, %v1986_v29 }
 0x3b0   : > { %v1285_v32 = vadd.f32 %v4048_v52, %v1284_v31  ;;  %v2021_v33 = vpack.c.bf16 %v3299_v30, %v3297_v28 }
 0x3b1   : > { %3300 = vtanh.f32 %v1987_v35 }
 0x3b2   : > { %1312 = vst [vmem:[%s4051_s12 + $0x40] sm:$0xff] %v1285_v32  ;;  %2121 = vmatmul.bf16.gmra.mxu0 %v2021_v33 }
 0x3b6   : > { %v1988_v36 = vpop.f32.mrf.mxu3 }
 0x3b7   : > { %v1989_v38 = vadd.f32 %v4035_v37, %v1988_v36  ;;  %v1286_v39 = vpop.f32.mrf.mxu0  ;;  %v3301_v40 = vpop.eup %3300 }
 0x3b8   : > { %v1287_v2 = vadd.f32 %v4048_v52, %v1286_v39 }
 0x3b9   : > { %3302 = vtanh.f32 %v1989_v38 }
 0x3ba   : > { %1313 = vst [vmem:[%s4051_s12 + $0x48] sm:$0xff] %v1287_v2 }
 0x3be   : > { %v1991_v60 = vpop.f32.mrf.mxu3 }
 0x3bf   : > { %v3303_v43 = vpop.eup %3302  ;;  %v1289_v44 = vpop.f32.mrf.mxu0  ;;  %v1992_v46 = vadd.f32 %v4035_v37, %v1991_v60 }
 0x3c0   : > { %v1290_v45 = vadd.f32 %v4048_v52, %v1289_v44  ;;  %v2022_v56 = vpack.c.bf16 %v3303_v43, %v3301_v40 }
 0x3c1   : > { %3304 = vtanh.f32 %v1992_v46 }
 0x3c2   : > { %1314 = vst [vmem:[%s4051_s12 + $0x50] sm:$0xff] %v1290_v45  ;;  %2126 = vmatmul.bf16.gmra.mxu0 %v2022_v56 }
 0x3c6   : > { %v1993_v47 = vpop.f32.mrf.mxu3 }
 0x3c7   : > { %v1994_v48 = vadd.f32 %v4035_v37, %v1993_v47  ;;  %v1291_v49 = vpop.f32.mrf.mxu0  ;;  %v3305_v51 = vpop.eup %3304 }
 0x3c8   : > { %v1292_v50 = vadd.f32 %v4048_v52, %v1291_v49 }
 0x3c9   : > { %3306 = vtanh.f32 %v1994_v48 }
 0x3ca   : > { %1315 = vst [vmem:[%s4051_s12 + $0x58] sm:$0xff] %v1292_v50 }
 0x3ce   : > { %v1996_v53 = vpop.f32.mrf.mxu3 }
 0x3cf   : > { %v3307_v54 = vpop.eup %3306  ;;  %v1294_v55 = vpop.f32.mrf.mxu0  ;;  %v1997_v62 = vadd.f32 %v4035_v37, %v1996_v53 }
 0x3d0   : > { %v1295_v58 = vadd.f32 %v4048_v52, %v1294_v55  ;;  %v2023_v59 = vpack.c.bf16 %v3307_v54, %v3305_v51 }
 0x3d1   : > { %3308 = vtanh.f32 %v1997_v62 }
 0x3d2   : > { %1316 = vst [vmem:[%s4051_s12 + $0x60] sm:$0xff] %v1295_v58  ;;  %2131 = vmatmul.bf16.gmra.mxu0 %v2023_v59 }
 0x3d6   : > { %v1998_v63 = vpop.f32.mrf.mxu3 }
 0x3d7   : > { %v1999_v0 = vadd.f32 %v4035_v37, %v1998_v63  ;;  %v1296_v1 = vpop.f32.mrf.mxu0  ;;  %v3309_v4 = vpop.eup %3308  ;;  %v4122_v37 = vld [vmem:[%s4211_s5 + $0x3] ss:$0 sm:$0xff] }
 0x3d8   : > { %v1297_v3 = vadd.f32 %v4048_v52, %v1296_v1 }
 0x3d9   : > { %3310 = vtanh.f32 %v1999_v0 }
 0x3da   : > { %1317 = vst [vmem:[%s4051_s12 + $0x68] sm:$0xff] %v1297_v3 }
 0x3df   : > { %v3311_v5 = vpop.eup %3310  ;;  %v1299_v6 = vpop.f32.mrf.mxu0 }
 0x3e0   : > { %v1300_v7 = vadd.f32 %v4048_v52, %v1299_v6  ;;  %v2024_v8 = vpack.c.bf16 %v3311_v5, %v3309_v4 }
 0x3e2   : > { %1318 = vst [vmem:[%s4051_s12 + $0x70] sm:$0xff] %v1300_v7  ;;  %2136 = vmatmul.bf16.gmra.mxu0 %v2024_v8 }
 0x3e7   : > { %v1301_v9 = vpop.f32.mrf.mxu0 }
 0x3e8   : > { %v1302_v10 = vadd.f32 %v4048_v52, %v1301_v9 }
 0x3ea   : > { %1319 = vst [vmem:[%s4051_s12 + $0x78] sm:$0xff] %v1302_v10 }
 0x3ef   : > { %v2102_v11 = vpop.f32.mrf.mxu0 }
 0x3f0   : > { %v2103_v12 = vadd.f32 %v4122_v37, %v2102_v11 }
 0x3f2   : > { %3312 = vtanh.f32 %v2103_v12 }
 0x3f7   : > { %v2104_v13 = vpop.f32.mrf.mxu0 }
 0x3f8   : > { %v2105_v14 = vadd.f32 %v4122_v37, %v2104_v13  ;;  %v3313_v15 = vpop.eup %3312 }
 0x3fa   : > { %3314 = vtanh.f32 %v2105_v14 }
 0x3ff   : > { %v2107_v16 = vpop.f32.mrf.mxu0 }
 0x400   : > { %v3315_v17 = vpop.eup %3314  ;;  %v2108_v20 = vadd.f32 %v4122_v37, %v2107_v16 }
 0x401   : > { %v2158_v18 = vpack.c.bf16 %v3315_v17, %v3313_v15 }
 0x402   : > { %3316 = vtanh.f32 %v2108_v20 }
 0x403   : > { %2238 = vmatmul.bf16.vlgmr.msra.gmra.mxu1 %v2158_v18 }
 0x407   : > { %v2109_v21 = vpop.f32.mrf.mxu0 }
 0x408   : > { %v2110_v19 = vadd.f32 %v4122_v37, %v2109_v21  ;;  %v3317_v22 = vpop.eup %3316 }
 0x40a   : > { %3318 = vtanh.f32 %v2110_v19 }
 0x40f   : > { %v2112_v23 = vpop.f32.mrf.mxu0 }
 0x410   : > { %v3319_v24 = vpop.eup %3318  ;;  %v2113_v25 = vadd.f32 %v4122_v37, %v2112_v23 }
 0x411   : > { %v2159_v42 = vpack.c.bf16 %v3319_v24, %v3317_v22 }
 0x412   : > { %3320 = vtanh.f32 %v2113_v25 }
 0x413   : > { %2243 = vmatmul.bf16.gmra.mxu1 %v2159_v42 }
 0x417   : > { %v2114_v26 = vpop.f32.mrf.mxu0 }
 0x418   : > { %v2115_v27 = vadd.f32 %v4122_v37, %v2114_v26  ;;  %v3321_v41 = vpop.eup %3320 }
 0x41a   : > { %3322 = vtanh.f32 %v2115_v27 }
 0x41f   : > { %v2117_v28 = vpop.f32.mrf.mxu0 }
 0x420   : > { %v3323_v29 = vpop.eup %3322  ;;  %v2118_v31 = vadd.f32 %v4122_v37, %v2117_v28 }
 0x421   : > { %v2160_v30 = vpack.c.bf16 %v3323_v29, %v3321_v41 }
 0x422   : > { %3324 = vtanh.f32 %v2118_v31 }
 0x423   : > { %2248 = vmatmul.bf16.gmra.mxu1 %v2160_v30 }
 0x427   : > { %v2119_v32 = vpop.f32.mrf.mxu0 }
 0x428   : > { %v2120_v33 = vadd.f32 %v4122_v37, %v2119_v32  ;;  %v3325_v34 = vpop.eup %3324 }
 0x42a   : > { %3326 = vtanh.f32 %v2120_v33 }
 0x42f   : > { %v2122_v35 = vpop.f32.mrf.mxu0 }
 0x430   : > { %v3327_v36 = vpop.eup %3326  ;;  %v2123_v39 = vadd.f32 %v4122_v37, %v2122_v35 }
 0x431   : > { %v2161_v38 = vpack.c.bf16 %v3327_v36, %v3325_v34 }
 0x432   : > { %3328 = vtanh.f32 %v2123_v39 }
 0x433   : > { %2253 = vmatmul.bf16.gmra.mxu1 %v2161_v38 }
 0x437   : > { %v2124_v2 = vpop.f32.mrf.mxu0 }
 0x438   : > { %v2125_v40 = vadd.f32 %v4122_v37, %v2124_v2  ;;  %v3329_v60 = vpop.eup %3328 }
 0x43a   : > { %3330 = vtanh.f32 %v2125_v40 }
 0x43f   : > { %v2127_v43 = vpop.f32.mrf.mxu0 }
 0x440   : > { %v3331_v44 = vpop.eup %3330  ;;  %v2128_v56 = vadd.f32 %v4122_v37, %v2127_v43 }
 0x441   : > { %v2162_v45 = vpack.c.bf16 %v3331_v44, %v3329_v60 }
 0x442   : > { %3332 = vtanh.f32 %v2128_v56 }
 0x443   : > { %2258 = vmatmul.bf16.gmra.mxu1 %v2162_v45 }
 0x447   : > { %v2129_v57 = vpop.f32.mrf.mxu0 }
 0x448   : > { %v2130_v46 = vadd.f32 %v4122_v37, %v2129_v57  ;;  %v3333_v47 = vpop.eup %3332 }
 0x44a   : > { %3334 = vtanh.f32 %v2130_v46 }
 0x44f   : > { %v2132_v48 = vpop.f32.mrf.mxu0 }
 0x450   : > { %v3335_v49 = vpop.eup %3334  ;;  %v2133_v51 = vadd.f32 %v4122_v37, %v2132_v48 }
 0x451   : > { %v2163_v50 = vpack.c.bf16 %v3335_v49, %v3333_v47 }
 0x452   : > { %3336 = vtanh.f32 %v2133_v51 }
 0x453   : > { %2263 = vmatmul.bf16.gmra.mxu1 %v2163_v50 }
 0x457   : > { %v2134_v53 = vpop.f32.mrf.mxu0 }
 0x458   : > { %v2135_v54 = vadd.f32 %v4122_v37, %v2134_v53  ;;  %v3337_v55 = vpop.eup %3336 }
 0x45a   : > { %3338 = vtanh.f32 %v2135_v54 }
 0x45f   : > { %v2137_v58 = vpop.f32.mrf.mxu0 }
 0x460   : > { %v3339_v59 = vpop.eup %3338  ;;  %v2138_v62 = vadd.f32 %v4122_v37, %v2137_v58 }
 0x461   : > { %v2164_v61 = vpack.c.bf16 %v3339_v59, %v3337_v55 }
 0x462   : > { %3340 = vtanh.f32 %v2138_v62 }
 0x463   : > { %2268 = vmatmul.bf16.gmra.mxu1 %v2164_v61 }
 0x467   : > { %v2139_v63 = vpop.f32.mrf.mxu0 }
 0x468   : > { %v2140_v0 = vadd.f32 %v4122_v37, %v2139_v63  ;;  %v3341_v1 = vpop.eup %3340 }
 0x46a   : > { %3342 = vtanh.f32 %v2140_v0 }
 0x470   : > { %v3343_v3 = vpop.eup %3342 }
 0x471   : > { %v2165_v4 = vpack.c.bf16 %v3343_v3, %v3341_v1 }
 0x473   : > { %2273 = vmatmul.bf16.gmra.mxu1 %v2165_v4 }
 0x480   : > { %v2239_v5 = vpop.f32.mrf.mxu1 }
 0x481   : > { %v2240_v6 = vadd.f32 %v4048_v52, %v2239_v5 }
 0x483   : > { %2849 = vst [vmem:[%s4051_s12 + $0x80] sm:$0xff] %v2240_v6 }
 0x488   : > { %v2241_v7 = vpop.f32.mrf.mxu1 }
 0x489   : > { %v2242_v8 = vadd.f32 %v4048_v52, %v2241_v7 }
 0x48b   : > { %2850 = vst [vmem:[%s4051_s12 + $0x88] sm:$0xff] %v2242_v8 }
 0x490   : > { %v2244_v9 = vpop.f32.mrf.mxu1 }
 0x491   : > { %v2245_v10 = vadd.f32 %v4048_v52, %v2244_v9 }
 0x493   : > { %2851 = vst [vmem:[%s4051_s12 + $0x90] sm:$0xff] %v2245_v10 }
 0x498   : > { %v2246_v11 = vpop.f32.mrf.mxu1 }
 0x499   : > { %v2247_v37 = vadd.f32 %v4048_v52, %v2246_v11 }
 0x49b   : > { %2852 = vst [vmem:[%s4051_s12 + $0x98] sm:$0xff] %v2247_v37 }
 0x4a0   : > { %v2249_v12 = vpop.f32.mrf.mxu1 }
 0x4a1   : > { %v2250_v13 = vadd.f32 %v4048_v52, %v2249_v12 }
 0x4a3   : > { %2853 = vst [vmem:[%s4051_s12 + $0xa0] sm:$0xff] %v2250_v13 }
 0x4a8   : > { %v2251_v14 = vpop.f32.mrf.mxu1 }
 0x4a9   : > { %v2252_v15 = vadd.f32 %v4048_v52, %v2251_v14 }
 0x4ab   : > { %2854 = vst [vmem:[%s4051_s12 + $0xa8] sm:$0xff] %v2252_v15 }
 0x4b0   : > { %v2254_v16 = vpop.f32.mrf.mxu1 }
 0x4b1   : > { %v2255_v17 = vadd.f32 %v4048_v52, %v2254_v16 }
 0x4b3   : > { %2855 = vst [vmem:[%s4051_s12 + $0xb0] sm:$0xff] %v2255_v17 }
 0x4b8   : > { %v2256_v18 = vpop.f32.mrf.mxu1 }
 0x4b9   : > { %v2257_v20 = vadd.f32 %v4048_v52, %v2256_v18 }
 0x4bb   : > { %2856 = vst [vmem:[%s4051_s12 + $0xb8] sm:$0xff] %v2257_v20 }
 0x4c0   : > { %v2259_v21 = vpop.f32.mrf.mxu1 }
 0x4c1   : > { %v2260_v19 = vadd.f32 %v4048_v52, %v2259_v21 }
 0x4c3   : > { %2857 = vst [vmem:[%s4051_s12 + $0xc0] sm:$0xff] %v2260_v19 }
 0x4c8   : > { %v2261_v22 = vpop.f32.mrf.mxu1 }
 0x4c9   : > { %v2262_v23 = vadd.f32 %v4048_v52, %v2261_v22 }
 0x4cb   : > { %2858 = vst [vmem:[%s4051_s12 + $0xc8] sm:$0xff] %v2262_v23 }
 0x4d0   : > { %v2264_v24 = vpop.f32.mrf.mxu1 }
 0x4d1   : > { %v2265_v42 = vadd.f32 %v4048_v52, %v2264_v24 }
 0x4d3   : > { %2859 = vst [vmem:[%s4051_s12 + $0xd0] sm:$0xff] %v2265_v42 }
 0x4d8   : > { %v2266_v25 = vpop.f32.mrf.mxu1 }
 0x4d9   : > { %v2267_v26 = vadd.f32 %v4048_v52, %v2266_v25 }
 0x4db   : > { %2860 = vst [vmem:[%s4051_s12 + $0xd8] sm:$0xff] %v2267_v26 }
 0x4e0   : > { %v2269_v27 = vpop.f32.mrf.mxu1 }
 0x4e1   : > { %v2270_v41 = vadd.f32 %v4048_v52, %v2269_v27 }
 0x4e3   : > { %2861 = vst [vmem:[%s4051_s12 + $0xe0] sm:$0xff] %v2270_v41 }
 0x4e8   : > { %v2271_v28 = vpop.f32.mrf.mxu1 }
 0x4e9   : > { %v2272_v29 = vadd.f32 %v4048_v52, %v2271_v28 }
 0x4eb   : > { %2862 = vst [vmem:[%s4051_s12 + $0xe8] sm:$0xff] %v2272_v29 }
 0x4f0   : > { %v2274_v30 = vpop.f32.mrf.mxu1 }
 0x4f1   : > { %v2275_v31 = vadd.f32 %v4048_v52, %v2274_v30 }
 0x4f3   : > { %2863 = vst [vmem:[%s4051_s12 + $0xf0] sm:$0xff] %v2275_v31 }
 0x4f8   : > { %v2276_v32 = vpop.f32.mrf.mxu1 }
 0x4f9   : > { %v2277_v33 = vadd.f32 %v4048_v52, %v2276_v32 }
 0x4fb   : > { %2864 = vst [vmem:[%s4051_s12 + $0xf8] sm:$0xff] %v2277_v33 }
 0x4fc   : > { %3371 = shalt.err (!%p3368_p3)
}
 0x4fd   : > { %s3409_s24 = smov 128   ;;  %s3410_s12 = smov 8  }
 0x4fe   : > { %2967 = dma.vmem_to_hbm [thread:$0]  (%p3494_p5), %s2310_s26, 4096, %s2312_s10, %s2297_s13, %s3409_s24, %s3409_s24, %s3410_s12  }
 0x4ff PF: > { %p2973_p4 = scmp.ge.s32.totalorder %s3406_s30, 2  ;;  %s2326_s21 = sand.u32 1, %s3394_s27  }
 0x500   : > { %s2327_s25 = scalar_lea.sflag [#allocation3], %s2326_s21 }
 0x501   : > { %p2970_p7 = pnand %p2973_p4, %p3498_p6 }
 0x503   : > { %p2971_p8 = pneg %p2970_p7 }
 0x505   : > { %3389 = dma.done.wait (%p2971_p8), %s2327_s25, 4096  }
 0x506   : > { %3391 = vsyncadd (%p2971_p8), %s2327_s25, 4294963200  ;;  %p18_p9 = scmp.ge.s32.totalorder %s3481_s11, 4   ;;  %s4217_s27 = smov %s3398_s28 }
 0x507   : > { %s4218_s28 = smov %s3402_s29  ;;  %s4219_s29 = smov %s3492_s14 }
 0x508   : > { %s4220_s30 = smov %s3481_s11  ;;  %20 = sbr.rel (!%p18_p9) target bundleno = 3 (0x3), region = 99 }
 0x50d   :  { %2333 = vsyncpa [#allocation3], 1 }
 0x50e   :  { %2335 = vsyncpa [#allocation3 + $0x1], 1 }

</bundles_post_ra>
